<compile_context>
chip_gen: v7x
topology: tpu7x:2x2x1
jax: 0.10.0
libtpu: 0.0.40
codegen_flags: <defaults>
</compile_context>

<pallas_src>
import functools
import math

import numpy as np
import jax
import jax.numpy as jnp
from jax.experimental import pallas as pl
from jax.experimental.pallas import tpu as pltpu


# --------------------------------------------------------------------------
# Config (small synthetic BERT)
# --------------------------------------------------------------------------
CFG = dict(
    vocab_size=50,
    hidden_size=32,
    num_heads=2,
    num_layers=2,
    intermediate_size=64,
    max_position=16,
    type_vocab_size=2,
    num_labels=2,
    layer_norm_eps=1e-12,
)


# --------------------------------------------------------------------------
# Fully fused BERT kernel: embedding gather -> L encoder layers -> pooler -> cls
# --------------------------------------------------------------------------
def _bert_fused_kernel(ids_ref, mask_ref, blockb_ref, wemb_ref, pos_ref,
                       wqkv_ref, wo_ref, w1_ref, w2_ref, vecs_ref, whead_ref,
                       o_ref, *, B, S, H, NH, DH, L, NL, IP, eps):
    BS = B * S

    def vec(r, n):                                   # (1, n) broadcastable row
        return vecs_ref[r:r + 1, 0:n]

    def layernorm(x, g, b):
        mean = jnp.mean(x, axis=-1, keepdims=True)
        var = jnp.mean(jnp.square(x - mean), axis=-1, keepdims=True)
        return (x - mean) * jax.lax.rsqrt(var + eps) * g + b

    def bmm(x, w):                                   # bf16 operands, fp32 MXU accum
        return jnp.dot(x.astype(jnp.bfloat16), w.astype(jnp.bfloat16),
                       preferred_element_type=jnp.float32)

    # ---- embedding gather + positional/token-type add (token_type_ids == 0) ----
    rows = []
    for b in range(B):                               # static unroll (B*S = 16 rows)
        for s in range(S):
            tok = ids_ref[b, s]                      # SMEM scalar -> dynamic row load
            rows.append(wemb_ref[tok].reshape(1, H) + pos_ref[s:s + 1, :])
    x = layernorm(jnp.concatenate(rows, axis=0), vec(0, H), vec(1, H))   # (BS, H)

    # ---- additive attention bias: key padding (VPU) + constant block-diag mask ----
    pad_bias = (1.0 - mask_ref[...].astype(jnp.float32)) * jnp.float32(-10000.0)  # (1, BS)
    bias = blockb_ref[...] + pad_bias                                             # (BS, BS)

    for l in range(L):                               # static unroll over layers
        base = 4 + 8 * l
        # fused QKV projection; Wq / bq were pre-scaled by 1/sqrt(DH) at pack time
        qkv = bmm(x, wqkv_ref[l]) + vec(base + 0, 3 * H)                 # (BS, 3H)

        attn = jnp.zeros((BS, H), jnp.float32)
        for h in range(NH):                          # static unroll (NH = 2)
            q = qkv[:, h * DH:(h + 1) * DH]
            k = qkv[:, H + h * DH:H + (h + 1) * DH]
            v = qkv[:, 2 * H + h * DH:2 * H + (h + 1) * DH]
            # full (BS, BS) scores; cross-batch entries killed by the block bias
            s_ = jax.lax.dot_general(
                q.astype(jnp.bfloat16), k.astype(jnp.bfloat16),
                (((1,), (1,)), ((), ())),
                preferred_element_type=jnp.float32) + bias
            s_ = s_ - jnp.max(s_, axis=-1, keepdims=True)
            p = jnp.exp(s_)
            p = p * pl.reciprocal(jnp.sum(p, axis=-1, keepdims=True), approx=True)
            ctx = jnp.dot(p.astype(jnp.bfloat16), v.astype(jnp.bfloat16),
                          preferred_element_type=jnp.float32)            # (BS, DH)
            # per-head row-slice of Wo: avoids the lane concat of head outputs
            attn = attn + bmm(ctx, wo_ref[l, h * DH:(h + 1) * DH, :])

        x = layernorm(attn + vec(base + 1, H) + x, vec(base + 2, H), vec(base + 3, H))

        # FFN with lane-dense (padded to 128) intermediate
        ffn = bmm(x, w1_ref[l]) + vec(base + 4, IP)                      # (BS, IP)
        # TODO(synk): HF BERT default is exact erf-GELU; tanh approximation kept
        # to stay on EUP-supported transcendentals.
        ffn = jax.nn.gelu(ffn, approximate=True)
        ffn = bmm(ffn, w2_ref[l]) + vec(base + 5, H)
        x = layernorm(ffn + x, vec(base + 6, H), vec(base + 7, H))

    # ---- pooler + classifier on all B*S rows; select CLS rows only for the store ----
    pooled = jnp.tanh(bmm(x, whead_ref[0]) + vec(2, H))                  # (BS, H)
    logits = bmm(pooled, whead_ref[1]) + vec(3, H)                       # (BS, H), cols >= NL are 0
    out = jnp.concatenate([logits[b * S:b * S + 1, 0:NL] for b in range(B)], axis=0)
    o_ref[...] = out.astype(o_ref.dtype)


# --------------------------------------------------------------------------
# Parameter init (deterministic, synthetic)
# --------------------------------------------------------------------------
def init_params(key, cfg):
    H = cfg["hidden_size"]
    I = cfg["intermediate_size"]

    def nrm(k, shape, std=0.02):
        return std * jax.random.normal(k, shape, jnp.float32)

    keys = jax.random.split(key, 8 + 16 * cfg["num_layers"])
    it = iter(keys)

    params = {
        "word_emb": nrm(next(it), (cfg["vocab_size"], H)),
        "pos_emb": nrm(next(it), (cfg["max_position"], H)),
        "type_emb": nrm(next(it), (cfg["type_vocab_size"], H)),
        "emb_ln_g": jnp.ones((H,), jnp.float32),
        "emb_ln_b": jnp.zeros((H,), jnp.float32),
        "pool_w": nrm(next(it), (H, H)),
        "pool_b": jnp.zeros((H,), jnp.float32),
        "cls_w": nrm(next(it), (H, cfg["num_labels"])),
        "cls_b": jnp.zeros((cfg["num_labels"],), jnp.float32),
        "layers": [],
    }
    for _ in range(cfg["num_layers"]):
        layer = {
            "wq": nrm(next(it), (H, H)), "bq": jnp.zeros((H,), jnp.float32),
            "wk": nrm(next(it), (H, H)), "bk": jnp.zeros((H,), jnp.float32),
            "wv": nrm(next(it), (H, H)), "bv": jnp.zeros((H,), jnp.float32),
            "wo": nrm(next(it), (H, H)), "bo": jnp.zeros((H,), jnp.float32),
            "ln1_g": jnp.ones((H,), jnp.float32), "ln1_b": jnp.zeros((H,), jnp.float32),
            "w1": nrm(next(it), (H, I)), "b1": jnp.zeros((I,), jnp.float32),
            "w2": nrm(next(it), (I, H)), "b2": jnp.zeros((H,), jnp.float32),
            "ln2_g": jnp.ones((H,), jnp.float32), "ln2_b": jnp.zeros((H,), jnp.float32),
        }
        params["layers"].append(layer)
    return params


# --------------------------------------------------------------------------
# Packing: QKV fusion + attention-scale folding, FFN lane padding, vector
# coalescing into one (4+8L, 128) f32 tensor, bf16 weight stacks.
# --------------------------------------------------------------------------
def pack_params(params, cfg):
    H = cfg["hidden_size"]
    I = cfg["intermediate_size"]
    NH = cfg["num_heads"]
    DH = H // NH
    L = cfg["num_layers"]
    NL = cfg["num_labels"]
    V = cfg["vocab_size"]
    scale = 1.0 / math.sqrt(DH)
    IP = ((I + 127) // 128) * 128
    LANE = 128
    wdt = jnp.bfloat16
    assert 3 * H <= LANE and IP <= LANE, "vector coalescing assumes 3H, IP <= 128"

    def padlane(v):
        return jnp.pad(v, (0, LANE - v.shape[0]))

    layers = params["layers"]
    vec_rows = [
        padlane(params["emb_ln_g"]), padlane(params["emb_ln_b"]),
        padlane(params["pool_b"]), padlane(params["cls_b"]),
    ]
    for lyr in layers:
        bqkv = jnp.concatenate([lyr["bq"] * scale, lyr["bk"], lyr["bv"]])
        vec_rows += [
            padlane(bqkv), padlane(lyr["bo"]),
            padlane(lyr["ln1_g"]), padlane(lyr["ln1_b"]),
            padlane(jnp.pad(lyr["b1"], (0, IP - I))),
            padlane(lyr["b2"]),
            padlane(lyr["ln2_g"]), padlane(lyr["ln2_b"]),
        ]
    vecs = jnp.stack(vec_rows, axis=0)                                   # (4+8L, 128) f32

    stack = lambda fn: jnp.stack([fn(l) for l in layers], axis=0)
    return dict(
        wemb=params["word_emb"].reshape(V, 1, H),                        # leading-axis gather table
        pos_type=params["pos_emb"] + params["type_emb"][0][None, :],     # token_type_ids == 0
        wqkv=stack(lambda l: jnp.concatenate(
            [l["wq"] * scale, l["wk"], l["wv"]], axis=1)).astype(wdt),   # (L, H, 3H)
        wo=stack(lambda l: l["wo"]).astype(wdt),                         # (L, H, H)
        w1=stack(lambda l: jnp.pad(l["w1"], ((0, 0), (0, IP - I)))).astype(wdt),  # (L, H, IP)
        w2=stack(lambda l: jnp.pad(l["w2"], ((0, IP - I), (0, 0)))).astype(wdt),  # (L, IP, H)
        vecs=vecs,
        whead=jnp.stack([params["pool_w"],
                         jnp.pad(params["cls_w"], ((0, 0), (0, H - NL)))],
                        axis=0).astype(wdt),                             # (2, H, H)
    )


# --------------------------------------------------------------------------
# Forward pass (== ClassificationBERTModel.forward) -- one pallas_call
# --------------------------------------------------------------------------
def classification_bert_forward(packed, input_ids, attention_mask):
    cfg = CFG
    B, S = input_ids.shape
    H = cfg["hidden_size"]
    NH = cfg["num_heads"]
    DH = H // NH
    L = cfg["num_layers"]
    NL = cfg["num_labels"]
    eps = cfg["layer_norm_eps"]
    IP = packed["w1"].shape[-1]
    BS = B * S

    # Compile-time constant: block-diagonal additive bias that forbids cross-batch
    # attention in the full (BS, BS) score matrix (numpy -> baked constant).
    block_bias = jnp.asarray(
        np.where(np.kron(np.eye(B), np.ones((S, S))) > 0, 0.0, -10000.0).astype(np.float32))

    mask_flat = attention_mask.reshape(1, BS).astype(jnp.int32)

    kernel = functools.partial(_bert_fused_kernel, B=B, S=S, H=H, NH=NH, DH=DH,
                               L=L, NL=NL, IP=IP, eps=eps)

    vmem = lambda: pl.BlockSpec(memory_space=pltpu.MemorySpace.VMEM)
    smem = lambda: pl.BlockSpec(memory_space=pltpu.MemorySpace.SMEM)

    args = (input_ids, mask_flat, block_bias,
            packed["wemb"], packed["pos_type"],
            packed["wqkv"], packed["wo"], packed["w1"], packed["w2"],
            packed["vecs"], packed["whead"])
    in_specs = [smem()] + [vmem() for _ in range(len(args) - 1)]

    # NOTE: for realistic H/I/L (and v7x's 64 MiB VMEM), stream weights with a
    # grid=(L,) "arbitrary" axis + per-layer index_maps instead of full residency.
    return pl.pallas_call(
        kernel,
        out_shape=jax.ShapeDtypeStruct((B, NL), jnp.float32),
        in_specs=in_specs,
        out_specs=vmem(),
    )(*args)


# --------------------------------------------------------------------------
# Pure-JAX reference (same packed bf16 weights, standard per-batch attention)
# --------------------------------------------------------------------------
def reference_forward(packed, input_ids, attention_mask):
    cfg = CFG
    B, S = input_ids.shape
    H = cfg["hidden_size"]
    NH = cfg["num_heads"]
    DH = H // NH
    L = cfg["num_layers"]
    NL = cfg["num_labels"]
    eps = cfg["layer_norm_eps"]
    IP = packed["w1"].shape[-1]

    vecs = packed["vecs"]
    vrow = lambda r, n: vecs[r, :n]

    def ln(x, g, b):
        m = jnp.mean(x, -1, keepdims=True)
        v = jnp.mean(jnp.square(x - m), -1, keepdims=True)
        return (x - m) * jax.lax.rsqrt(v + eps) * g + b

    def mm(x, w):
        return jnp.dot(x.astype(jnp.bfloat16), w.astype(jnp.bfloat16),
                       preferred_element_type=jnp.float32)

    wemb = packed["wemb"].reshape(-1, H)
    emb = jnp.take(wemb, input_ids, axis=0) + packed["pos_type"][None, :S, :]
    x = ln(emb.reshape(B * S, H), vrow(0, H), vrow(1, H))
    bias = (1.0 - attention_mask.astype(jnp.float32)) * -10000.0          # (B, S)

    for l in range(L):
        base = 4 + 8 * l
        qkv = mm(x, packed["wqkv"][l]) + vrow(base, 3 * H)
        q, k, v = jnp.split(qkv, 3, axis=-1)
        heads = lambda t: t.reshape(B, S, NH, DH).transpose(0, 2, 1, 3)
        q, k, v = heads(q), heads(k), heads(v)
        s = jnp.einsum("bhqd,bhkd->bhqk", q.astype(jnp.bfloat16), k.astype(jnp.bfloat16),
                       preferred_element_type=jnp.float32) + bias[:, None, None, :]
        p = jax.nn.softmax(s, axis=-1)
        ctx = jnp.einsum("bhqk,bhkd->bhqd", p.astype(jnp.bfloat16), v.astype(jnp.bfloat16),
                         preferred_element_type=jnp.float32)
        ctx = ctx.transpose(0, 2, 1, 3).reshape(B * S, H)
        x = ln(mm(ctx, packed["wo"][l]) + vrow(base + 1, H) + x,
               vrow(base + 2, H), vrow(base + 3, H))
        f = jax.nn.gelu(mm(x, packed["w1"][l]) + vrow(base + 4, IP), approximate=True)
        f = mm(f, packed["w2"][l]) + vrow(base + 5, H)
        x = ln(f + x, vrow(base + 6, H), vrow(base + 7, H))

    cls_tok = x.reshape(B, S, H)[:, 0, :]
    pooled = jnp.tanh(mm(cls_tok, packed["whead"][0]) + vrow(2, H))
    logits = mm(pooled, packed["whead"][1]) + vrow(3, H)
    return logits[:, :NL]


# --------------------------------------------------------------------------
if __name__ == "__main__":
    B, S = 2, 8
    key = jax.random.PRNGKey(0)
    k_param, k_ids = jax.random.split(key)

    params = init_params(k_param, CFG)
    packed = pack_params(params, CFG)

    input_ids = jax.random.randint(k_ids, (B, S), 0, CFG["vocab_size"], dtype=jnp.int32)
    attention_mask = jnp.ones((B, S), jnp.int32).at[1, 6:].set(0)   # pad last 2 of seq 1

    fwd = jax.jit(classification_bert_forward)
    logits = jax.block_until_ready(fwd(packed, input_ids, attention_mask))

    assert logits.shape == (B, CFG["num_labels"])
    assert logits.dtype == jnp.float32
    assert bool(jnp.all(jnp.isfinite(logits)))

    ref = jax.block_until_ready(jax.jit(reference_forward)(packed, input_ids, attention_mask))
    assert float(jnp.max(jnp.abs(logits - ref))) < 1e-3, float(jnp.max(jnp.abs(logits - ref)))

    print("KERNEL_OK")
</pallas_src>

<mosaic_0001>
module attributes {stable_mosaic.version = 11 : i64} {
  func.func @_bert_fused_kernel(%arg0: memref<2x8xi32, #tpu.memory_space<smem>>, %arg1: memref<1x16xi32, #tpu.memory_space<vmem>>, %arg2: memref<16x16xf32, #tpu.memory_space<vmem>>, %arg3: memref<50x1x32xf32, #tpu.memory_space<vmem>>, %arg4: memref<16x32xf32, #tpu.memory_space<vmem>>, %arg5: memref<2x32x96xbf16, #tpu.memory_space<vmem>>, %arg6: memref<2x32x32xbf16, #tpu.memory_space<vmem>>, %arg7: memref<2x32x128xbf16, #tpu.memory_space<vmem>>, %arg8: memref<2x128x32xbf16, #tpu.memory_space<vmem>>, %arg9: memref<20x128xf32, #tpu.memory_space<vmem>>, %arg10: memref<2x32x32xbf16, #tpu.memory_space<vmem>>, %arg11: memref<2x2xf32, #tpu.memory_space<vmem>>) attributes {dimension_semantics = [], scalar_prefetch = 0 : i64, scratch_operands = 0 : i64, tpu.core_type = #tpu.core_type<tc>} {
    %c0 = arith.constant 0 : index
    %c0_0 = arith.constant 0 : index
    %0 = memref.load %arg0[%c0, %c0_0] : memref<2x8xi32, #tpu.memory_space<smem>>
    %1 = arith.index_cast %0 : i32 to index
    %c0_1 = arith.constant 0 : index
    %c0_2 = arith.constant 0 : index
    %2 = vector.load %arg3[%1, %c0_1, %c0_2] : memref<50x1x32xf32, #tpu.memory_space<vmem>>, vector<1x1x32xf32>
    %3 = vector.shape_cast %2 : vector<1x1x32xf32> to vector<1x32xf32>
    %c0_3 = arith.constant 0 : index
    %c0_4 = arith.constant 0 : index
    %4 = vector.load %arg4[%c0_3, %c0_4] : memref<16x32xf32, #tpu.memory_space<vmem>>, vector<1x32xf32>
    %5 = arith.addf %3, %4 : vector<1x32xf32>
    %c0_5 = arith.constant 0 : index
    %c1 = arith.constant 1 : index
    %6 = memref.load %arg0[%c0_5, %c1] : memref<2x8xi32, #tpu.memory_space<smem>>
    %7 = arith.index_cast %6 : i32 to index
    %c0_6 = arith.constant 0 : index
    %c0_7 = arith.constant 0 : index
    %8 = vector.load %arg3[%7, %c0_6, %c0_7] : memref<50x1x32xf32, #tpu.memory_space<vmem>>, vector<1x1x32xf32>
    %9 = vector.shape_cast %8 : vector<1x1x32xf32> to vector<1x32xf32>
    %c1_8 = arith.constant 1 : index
    %c0_9 = arith.constant 0 : index
    %10 = vector.load %arg4[%c1_8, %c0_9] : memref<16x32xf32, #tpu.memory_space<vmem>>, vector<1x32xf32>
    %11 = arith.addf %9, %10 : vector<1x32xf32>
    %c0_10 = arith.constant 0 : index
    %c2 = arith.constant 2 : index
    %12 = memref.load %arg0[%c0_10, %c2] : memref<2x8xi32, #tpu.memory_space<smem>>
    %13 = arith.index_cast %12 : i32 to index
    %c0_11 = arith.constant 0 : index
    %c0_12 = arith.constant 0 : index
    %14 = vector.load %arg3[%13, %c0_11, %c0_12] : memref<50x1x32xf32, #tpu.memory_space<vmem>>, vector<1x1x32xf32>
    %15 = vector.shape_cast %14 : vector<1x1x32xf32> to vector<1x32xf32>
    %c2_13 = arith.constant 2 : index
    %c0_14 = arith.constant 0 : index
    %16 = vector.load %arg4[%c2_13, %c0_14] : memref<16x32xf32, #tpu.memory_space<vmem>>, vector<1x32xf32>
    %17 = arith.addf %15, %16 : vector<1x32xf32>
    %c0_15 = arith.constant 0 : index
    %c3 = arith.constant 3 : index
    %18 = memref.load %arg0[%c0_15, %c3] : memref<2x8xi32, #tpu.memory_space<smem>>
    %19 = arith.index_cast %18 : i32 to index
    %c0_16 = arith.constant 0 : index
    %c0_17 = arith.constant 0 : index
    %20 = vector.load %arg3[%19, %c0_16, %c0_17] : memref<50x1x32xf32, #tpu.memory_space<vmem>>, vector<1x1x32xf32>
    %21 = vector.shape_cast %20 : vector<1x1x32xf32> to vector<1x32xf32>
    %c3_18 = arith.constant 3 : index
    %c0_19 = arith.constant 0 : index
    %22 = vector.load %arg4[%c3_18, %c0_19] : memref<16x32xf32, #tpu.memory_space<vmem>>, vector<1x32xf32>
    %23 = arith.addf %21, %22 : vector<1x32xf32>
    %c0_20 = arith.constant 0 : index
    %c4 = arith.constant 4 : index
    %24 = memref.load %arg0[%c0_20, %c4] : memref<2x8xi32, #tpu.memory_space<smem>>
    %25 = arith.index_cast %24 : i32 to index
    %c0_21 = arith.constant 0 : index
    %c0_22 = arith.constant 0 : index
    %26 = vector.load %arg3[%25, %c0_21, %c0_22] : memref<50x1x32xf32, #tpu.memory_space<vmem>>, vector<1x1x32xf32>
    %27 = vector.shape_cast %26 : vector<1x1x32xf32> to vector<1x32xf32>
    %c4_23 = arith.constant 4 : index
    %c0_24 = arith.constant 0 : index
    %28 = vector.load %arg4[%c4_23, %c0_24] : memref<16x32xf32, #tpu.memory_space<vmem>>, vector<1x32xf32>
    %29 = arith.addf %27, %28 : vector<1x32xf32>
    %c0_25 = arith.constant 0 : index
    %c5 = arith.constant 5 : index
    %30 = memref.load %arg0[%c0_25, %c5] : memref<2x8xi32, #tpu.memory_space<smem>>
    %31 = arith.index_cast %30 : i32 to index
    %c0_26 = arith.constant 0 : index
    %c0_27 = arith.constant 0 : index
    %32 = vector.load %arg3[%31, %c0_26, %c0_27] : memref<50x1x32xf32, #tpu.memory_space<vmem>>, vector<1x1x32xf32>
    %33 = vector.shape_cast %32 : vector<1x1x32xf32> to vector<1x32xf32>
    %c5_28 = arith.constant 5 : index
    %c0_29 = arith.constant 0 : index
    %34 = vector.load %arg4[%c5_28, %c0_29] : memref<16x32xf32, #tpu.memory_space<vmem>>, vector<1x32xf32>
    %35 = arith.addf %33, %34 : vector<1x32xf32>
    %c0_30 = arith.constant 0 : index
    %c6 = arith.constant 6 : index
    %36 = memref.load %arg0[%c0_30, %c6] : memref<2x8xi32, #tpu.memory_space<smem>>
    %37 = arith.index_cast %36 : i32 to index
    %c0_31 = arith.constant 0 : index
    %c0_32 = arith.constant 0 : index
    %38 = vector.load %arg3[%37, %c0_31, %c0_32] : memref<50x1x32xf32, #tpu.memory_space<vmem>>, vector<1x1x32xf32>
    %39 = vector.shape_cast %38 : vector<1x1x32xf32> to vector<1x32xf32>
    %c6_33 = arith.constant 6 : index
    %c0_34 = arith.constant 0 : index
    %40 = vector.load %arg4[%c6_33, %c0_34] : memref<16x32xf32, #tpu.memory_space<vmem>>, vector<1x32xf32>
    %41 = arith.addf %39, %40 : vector<1x32xf32>
    %c0_35 = arith.constant 0 : index
    %c7 = arith.constant 7 : index
    %42 = memref.load %arg0[%c0_35, %c7] : memref<2x8xi32, #tpu.memory_space<smem>>
    %43 = arith.index_cast %42 : i32 to index
    %c0_36 = arith.constant 0 : index
    %c0_37 = arith.constant 0 : index
    %44 = vector.load %arg3[%43, %c0_36, %c0_37] : memref<50x1x32xf32, #tpu.memory_space<vmem>>, vector<1x1x32xf32>
    %45 = vector.shape_cast %44 : vector<1x1x32xf32> to vector<1x32xf32>
    %c7_38 = arith.constant 7 : index
    %c0_39 = arith.constant 0 : index
    %46 = vector.load %arg4[%c7_38, %c0_39] : memref<16x32xf32, #tpu.memory_space<vmem>>, vector<1x32xf32>
    %47 = arith.addf %45, %46 : vector<1x32xf32>
    %c1_40 = arith.constant 1 : index
    %c0_41 = arith.constant 0 : index
    %48 = memref.load %arg0[%c1_40, %c0_41] : memref<2x8xi32, #tpu.memory_space<smem>>
    %49 = arith.index_cast %48 : i32 to index
    %c0_42 = arith.constant 0 : index
    %c0_43 = arith.constant 0 : index
    %50 = vector.load %arg3[%49, %c0_42, %c0_43] : memref<50x1x32xf32, #tpu.memory_space<vmem>>, vector<1x1x32xf32>
    %51 = vector.shape_cast %50 : vector<1x1x32xf32> to vector<1x32xf32>
    %c0_44 = arith.constant 0 : index
    %c0_45 = arith.constant 0 : index
    %52 = vector.load %arg4[%c0_44, %c0_45] : memref<16x32xf32, #tpu.memory_space<vmem>>, vector<1x32xf32>
    %53 = arith.addf %51, %52 : vector<1x32xf32>
    %c1_46 = arith.constant 1 : index
    %c1_47 = arith.constant 1 : index
    %54 = memref.load %arg0[%c1_46, %c1_47] : memref<2x8xi32, #tpu.memory_space<smem>>
    %55 = arith.index_cast %54 : i32 to index
    %c0_48 = arith.constant 0 : index
    %c0_49 = arith.constant 0 : index
    %56 = vector.load %arg3[%55, %c0_48, %c0_49] : memref<50x1x32xf32, #tpu.memory_space<vmem>>, vector<1x1x32xf32>
    %57 = vector.shape_cast %56 : vector<1x1x32xf32> to vector<1x32xf32>
    %c1_50 = arith.constant 1 : index
    %c0_51 = arith.constant 0 : index
    %58 = vector.load %arg4[%c1_50, %c0_51] : memref<16x32xf32, #tpu.memory_space<vmem>>, vector<1x32xf32>
    %59 = arith.addf %57, %58 : vector<1x32xf32>
    %c1_52 = arith.constant 1 : index
    %c2_53 = arith.constant 2 : index
    %60 = memref.load %arg0[%c1_52, %c2_53] : memref<2x8xi32, #tpu.memory_space<smem>>
    %61 = arith.index_cast %60 : i32 to index
    %c0_54 = arith.constant 0 : index
    %c0_55 = arith.constant 0 : index
    %62 = vector.load %arg3[%61, %c0_54, %c0_55] : memref<50x1x32xf32, #tpu.memory_space<vmem>>, vector<1x1x32xf32>
    %63 = vector.shape_cast %62 : vector<1x1x32xf32> to vector<1x32xf32>
    %c2_56 = arith.constant 2 : index
    %c0_57 = arith.constant 0 : index
    %64 = vector.load %arg4[%c2_56, %c0_57] : memref<16x32xf32, #tpu.memory_space<vmem>>, vector<1x32xf32>
    %65 = arith.addf %63, %64 : vector<1x32xf32>
    %c1_58 = arith.constant 1 : index
    %c3_59 = arith.constant 3 : index
    %66 = memref.load %arg0[%c1_58, %c3_59] : memref<2x8xi32, #tpu.memory_space<smem>>
    %67 = arith.index_cast %66 : i32 to index
    %c0_60 = arith.constant 0 : index
    %c0_61 = arith.constant 0 : index
    %68 = vector.load %arg3[%67, %c0_60, %c0_61] : memref<50x1x32xf32, #tpu.memory_space<vmem>>, vector<1x1x32xf32>
    %69 = vector.shape_cast %68 : vector<1x1x32xf32> to vector<1x32xf32>
    %c3_62 = arith.constant 3 : index
    %c0_63 = arith.constant 0 : index
    %70 = vector.load %arg4[%c3_62, %c0_63] : memref<16x32xf32, #tpu.memory_space<vmem>>, vector<1x32xf32>
    %71 = arith.addf %69, %70 : vector<1x32xf32>
    %c1_64 = arith.constant 1 : index
    %c4_65 = arith.constant 4 : index
    %72 = memref.load %arg0[%c1_64, %c4_65] : memref<2x8xi32, #tpu.memory_space<smem>>
    %73 = arith.index_cast %72 : i32 to index
    %c0_66 = arith.constant 0 : index
    %c0_67 = arith.constant 0 : index
    %74 = vector.load %arg3[%73, %c0_66, %c0_67] : memref<50x1x32xf32, #tpu.memory_space<vmem>>, vector<1x1x32xf32>
    %75 = vector.shape_cast %74 : vector<1x1x32xf32> to vector<1x32xf32>
    %c4_68 = arith.constant 4 : index
    %c0_69 = arith.constant 0 : index
    %76 = vector.load %arg4[%c4_68, %c0_69] : memref<16x32xf32, #tpu.memory_space<vmem>>, vector<1x32xf32>
    %77 = arith.addf %75, %76 : vector<1x32xf32>
    %c1_70 = arith.constant 1 : index
    %c5_71 = arith.constant 5 : index
    %78 = memref.load %arg0[%c1_70, %c5_71] : memref<2x8xi32, #tpu.memory_space<smem>>
    %79 = arith.index_cast %78 : i32 to index
    %c0_72 = arith.constant 0 : index
    %c0_73 = arith.constant 0 : index
    %80 = vector.load %arg3[%79, %c0_72, %c0_73] : memref<50x1x32xf32, #tpu.memory_space<vmem>>, vector<1x1x32xf32>
    %81 = vector.shape_cast %80 : vector<1x1x32xf32> to vector<1x32xf32>
    %c5_74 = arith.constant 5 : index
    %c0_75 = arith.constant 0 : index
    %82 = vector.load %arg4[%c5_74, %c0_75] : memref<16x32xf32, #tpu.memory_space<vmem>>, vector<1x32xf32>
    %83 = arith.addf %81, %82 : vector<1x32xf32>
    %c1_76 = arith.constant 1 : index
    %c6_77 = arith.constant 6 : index
    %84 = memref.load %arg0[%c1_76, %c6_77] : memref<2x8xi32, #tpu.memory_space<smem>>
    %85 = arith.index_cast %84 : i32 to index
    %c0_78 = arith.constant 0 : index
    %c0_79 = arith.constant 0 : index
    %86 = vector.load %arg3[%85, %c0_78, %c0_79] : memref<50x1x32xf32, #tpu.memory_space<vmem>>, vector<1x1x32xf32>
    %87 = vector.shape_cast %86 : vector<1x1x32xf32> to vector<1x32xf32>
    %c6_80 = arith.constant 6 : index
    %c0_81 = arith.constant 0 : index
    %88 = vector.load %arg4[%c6_80, %c0_81] : memref<16x32xf32, #tpu.memory_space<vmem>>, vector<1x32xf32>
    %89 = arith.addf %87, %88 : vector<1x32xf32>
    %c1_82 = arith.constant 1 : index
    %c7_83 = arith.constant 7 : index
    %90 = memref.load %arg0[%c1_82, %c7_83] : memref<2x8xi32, #tpu.memory_space<smem>>
    %91 = arith.index_cast %90 : i32 to index
    %c0_84 = arith.constant 0 : index
    %c0_85 = arith.constant 0 : index
    %92 = vector.load %arg3[%91, %c0_84, %c0_85] : memref<50x1x32xf32, #tpu.memory_space<vmem>>, vector<1x1x32xf32>
    %93 = vector.shape_cast %92 : vector<1x1x32xf32> to vector<1x32xf32>
    %c7_86 = arith.constant 7 : index
    %c0_87 = arith.constant 0 : index
    %94 = vector.load %arg4[%c7_86, %c0_87] : memref<16x32xf32, #tpu.memory_space<vmem>>, vector<1x32xf32>
    %95 = arith.addf %93, %94 : vector<1x32xf32>
    %96 = tpu.concatenate %5, %11, %17, %23, %29, %35, %41, %47, %53, %59, %65, %71, %77, %83, %89, %95 in 0 : vector<1x32xf32>, vector<1x32xf32>, vector<1x32xf32>, vector<1x32xf32>, vector<1x32xf32>, vector<1x32xf32>, vector<1x32xf32>, vector<1x32xf32>, vector<1x32xf32>, vector<1x32xf32>, vector<1x32xf32>, vector<1x32xf32>, vector<1x32xf32>, vector<1x32xf32>, vector<1x32xf32>, vector<1x32xf32> -> vector<16x32xf32>
    %c0_88 = arith.constant 0 : index
    %c0_89 = arith.constant 0 : index
    %97 = vector.load %arg9[%c0_88, %c0_89] : memref<20x128xf32, #tpu.memory_space<vmem>>, vector<1x32xf32>
    %c1_90 = arith.constant 1 : index
    %c0_91 = arith.constant 0 : index
    %98 = vector.load %arg9[%c1_90, %c0_91] : memref<20x128xf32, #tpu.memory_space<vmem>>, vector<1x32xf32>
    %cst = arith.constant dense<0.000000e+00> : vector<16xf32>
    %99 = vector.multi_reduction <add>, %96, %cst [1] : vector<16x32xf32> to vector<16xf32>
    %100 = vector.shape_cast %99 : vector<16xf32> to vector<16x1xf32>
    %cst_92 = arith.constant 3.200000e+01 : f32
    %101 = vector.broadcast %cst_92 : f32 to vector<16x1xf32>
    %102 = arith.divf %100, %101 : vector<16x1xf32>
    %103 = vector.broadcast %102 : vector<16x1xf32> to vector<16x32xf32>
    %104 = arith.subf %96, %103 : vector<16x32xf32>
    %105 = arith.mulf %104, %104 : vector<16x32xf32>
    %cst_93 = arith.constant dense<0.000000e+00> : vector<16xf32>
    %106 = vector.multi_reduction <add>, %105, %cst_93 [1] : vector<16x32xf32> to vector<16xf32>
    %107 = vector.shape_cast %106 : vector<16xf32> to vector<16x1xf32>
    %cst_94 = arith.constant 3.200000e+01 : f32
    %108 = vector.broadcast %cst_94 : f32 to vector<16x1xf32>
    %109 = arith.divf %107, %108 : vector<16x1xf32>
    %110 = vector.broadcast %102 : vector<16x1xf32> to vector<16x32xf32>
    %111 = arith.subf %96, %110 : vector<16x32xf32>
    %cst_95 = arith.constant 9.99999996E-13 : f32
    %112 = vector.broadcast %cst_95 : f32 to vector<16x1xf32>
    %113 = arith.addf %109, %112 : vector<16x1xf32>
    %114 = math.rsqrt %113 : vector<16x1xf32>
    %115 = vector.broadcast %114 : vector<16x1xf32> to vector<16x32xf32>
    %116 = arith.mulf %111, %115 : vector<16x32xf32>
    %117 = vector.broadcast %97 : vector<1x32xf32> to vector<16x32xf32>
    %118 = arith.mulf %116, %117 : vector<16x32xf32>
    %119 = vector.broadcast %98 : vector<1x32xf32> to vector<16x32xf32>
    %120 = arith.addf %118, %119 : vector<16x32xf32>
    %c0_96 = arith.constant 0 : index
    %c0_97 = arith.constant 0 : index
    %121 = vector.load %arg1[%c0_96, %c0_97] : memref<1x16xi32, #tpu.memory_space<vmem>>, vector<1x16xi32>
    %122 = arith.sitofp %121 : vector<1x16xi32> to vector<1x16xf32>
    %cst_98 = arith.constant 1.000000e+00 : f32
    %123 = vector.broadcast %cst_98 : f32 to vector<1x16xf32>
    %124 = arith.subf %123, %122 : vector<1x16xf32>
    %cst_99 = arith.constant -1.000000e+04 : f32
    %125 = vector.broadcast %cst_99 : f32 to vector<1x16xf32>
    %126 = arith.mulf %124, %125 : vector<1x16xf32>
    %c0_100 = arith.constant 0 : index
    %c0_101 = arith.constant 0 : index
    %127 = vector.load %arg2[%c0_100, %c0_101] : memref<16x16xf32, #tpu.memory_space<vmem>>, vector<16x16xf32>
    %128 = vector.broadcast %126 : vector<1x16xf32> to vector<16x16xf32>
    %129 = arith.addf %127, %128 : vector<16x16xf32>
    %c0_102 = arith.constant 0 : index
    %c0_103 = arith.constant 0 : index
    %c0_104 = arith.constant 0 : index
    %130 = vector.load %arg5[%c0_102, %c0_103, %c0_104] : memref<2x32x96xbf16, #tpu.memory_space<vmem>>, vector<1x32x96xbf16>
    %131 = vector.shape_cast %130 : vector<1x32x96xbf16> to vector<32x96xbf16>
    %132 = arith.truncf %120 : vector<16x32xf32> to vector<16x32xbf16>
    %cst_105 = arith.constant dense<0.000000e+00> : vector<16x96xf32>
    %133 = tpu.matmul %132, %131, %cst_105 {dimension_numbers = #tpu.dot_dimension_numbers<[1], [0], [0], [1], [0, 0, 1, 1], [], []>} : vector<16x32xbf16>, vector<32x96xbf16>, vector<16x96xf32> -> vector<16x96xf32>
    %c4_106 = arith.constant 4 : index
    %c0_107 = arith.constant 0 : index
    %134 = vector.load %arg9[%c4_106, %c0_107] : memref<20x128xf32, #tpu.memory_space<vmem>>, vector<1x96xf32>
    %135 = vector.broadcast %134 : vector<1x96xf32> to vector<16x96xf32>
    %136 = arith.addf %133, %135 : vector<16x96xf32>
    %cst_108 = arith.constant 0.000000e+00 : f32
    %137 = vector.broadcast %cst_108 : f32 to vector<16x32xf32>
    %138 = vector.extract_strided_slice %136 {offsets = [0, 0], sizes = [16, 16], strides = [1, 1]} : vector<16x96xf32> to vector<16x16xf32>
    %139 = vector.extract_strided_slice %136 {offsets = [0, 32], sizes = [16, 16], strides = [1, 1]} : vector<16x96xf32> to vector<16x16xf32>
    %140 = vector.extract_strided_slice %136 {offsets = [0, 64], sizes = [16, 16], strides = [1, 1]} : vector<16x96xf32> to vector<16x16xf32>
    %141 = arith.truncf %138 : vector<16x16xf32> to vector<16x16xbf16>
    %142 = arith.truncf %139 : vector<16x16xf32> to vector<16x16xbf16>
    %cst_109 = arith.constant dense<0.000000e+00> : vector<16x16xf32>
    %143 = tpu.matmul %141, %142, %cst_109 {dimension_numbers = #tpu.dot_dimension_numbers<[1], [1], [0], [0], [0, 0, 1, 0], [], []>} : vector<16x16xbf16>, vector<16x16xbf16>, vector<16x16xf32> -> vector<16x16xf32>
    %144 = arith.addf %143, %129 : vector<16x16xf32>
    %cst_110 = arith.constant dense<0xFF800000> : vector<16xf32>
    %145 = vector.multi_reduction <maximumf>, %144, %cst_110 [1] : vector<16x16xf32> to vector<16xf32>
    %146 = vector.shape_cast %145 : vector<16xf32> to vector<16x1xf32>
    %147 = vector.broadcast %146 : vector<16x1xf32> to vector<16x16xf32>
    %148 = arith.subf %144, %147 : vector<16x16xf32>
    %149 = math.exp %148 : vector<16x16xf32>
    %cst_111 = arith.constant dense<0.000000e+00> : vector<16xf32>
    %150 = vector.multi_reduction <add>, %149, %cst_111 [1] : vector<16x16xf32> to vector<16xf32>
    %151 = vector.shape_cast %150 : vector<16xf32> to vector<16x1xf32>
    %152 = tpu.reciprocal %151 {approx = true} : vector<16x1xf32> -> vector<16x1xf32>
    %153 = vector.broadcast %152 : vector<16x1xf32> to vector<16x16xf32>
    %154 = arith.mulf %149, %153 : vector<16x16xf32>
    %155 = arith.truncf %154 : vector<16x16xf32> to vector<16x16xbf16>
    %156 = arith.truncf %140 : vector<16x16xf32> to vector<16x16xbf16>
    %cst_112 = arith.constant dense<0.000000e+00> : vector<16x16xf32>
    %157 = tpu.matmul %155, %156, %cst_112 {dimension_numbers = #tpu.dot_dimension_numbers<[1], [0], [0], [1], [0, 0, 1, 1], [], []>} : vector<16x16xbf16>, vector<16x16xbf16>, vector<16x16xf32> -> vector<16x16xf32>
    %c0_113 = arith.constant 0 : index
    %c0_114 = arith.constant 0 : index
    %c0_115 = arith.constant 0 : index
    %158 = vector.load %arg6[%c0_113, %c0_114, %c0_115] : memref<2x32x32xbf16, #tpu.memory_space<vmem>>, vector<1x16x32xbf16>
    %159 = vector.shape_cast %158 : vector<1x16x32xbf16> to vector<16x32xbf16>
    %160 = arith.truncf %157 : vector<16x16xf32> to vector<16x16xbf16>
    %cst_116 = arith.constant dense<0.000000e+00> : vector<16x32xf32>
    %161 = tpu.matmul %160, %159, %cst_116 {dimension_numbers = #tpu.dot_dimension_numbers<[1], [0], [0], [1], [0, 0, 1, 1], [], []>} : vector<16x16xbf16>, vector<16x32xbf16>, vector<16x32xf32> -> vector<16x32xf32>
    %162 = arith.addf %137, %161 : vector<16x32xf32>
    %163 = vector.extract_strided_slice %136 {offsets = [0, 16], sizes = [16, 16], strides = [1, 1]} : vector<16x96xf32> to vector<16x16xf32>
    %164 = vector.extract_strided_slice %136 {offsets = [0, 48], sizes = [16, 16], strides = [1, 1]} : vector<16x96xf32> to vector<16x16xf32>
    %165 = vector.extract_strided_slice %136 {offsets = [0, 80], sizes = [16, 16], strides = [1, 1]} : vector<16x96xf32> to vector<16x16xf32>
    %166 = arith.truncf %163 : vector<16x16xf32> to vector<16x16xbf16>
    %167 = arith.truncf %164 : vector<16x16xf32> to vector<16x16xbf16>
    %cst_117 = arith.constant dense<0.000000e+00> : vector<16x16xf32>
    %168 = tpu.matmul %166, %167, %cst_117 {dimension_numbers = #tpu.dot_dimension_numbers<[1], [1], [0], [0], [0, 0, 1, 0], [], []>} : vector<16x16xbf16>, vector<16x16xbf16>, vector<16x16xf32> -> vector<16x16xf32>
    %169 = arith.addf %168, %129 : vector<16x16xf32>
    %cst_118 = arith.constant dense<0xFF800000> : vector<16xf32>
    %170 = vector.multi_reduction <maximumf>, %169, %cst_118 [1] : vector<16x16xf32> to vector<16xf32>
    %171 = vector.shape_cast %170 : vector<16xf32> to vector<16x1xf32>
    %172 = vector.broadcast %171 : vector<16x1xf32> to vector<16x16xf32>
    %173 = arith.subf %169, %172 : vector<16x16xf32>
    %174 = math.exp %173 : vector<16x16xf32>
    %cst_119 = arith.constant dense<0.000000e+00> : vector<16xf32>
    %175 = vector.multi_reduction <add>, %174, %cst_119 [1] : vector<16x16xf32> to vector<16xf32>
    %176 = vector.shape_cast %175 : vector<16xf32> to vector<16x1xf32>
    %177 = tpu.reciprocal %176 {approx = true} : vector<16x1xf32> -> vector<16x1xf32>
    %178 = vector.broadcast %177 : vector<16x1xf32> to vector<16x16xf32>
    %179 = arith.mulf %174, %178 : vector<16x16xf32>
    %180 = arith.truncf %179 : vector<16x16xf32> to vector<16x16xbf16>
    %181 = arith.truncf %165 : vector<16x16xf32> to vector<16x16xbf16>
    %cst_120 = arith.constant dense<0.000000e+00> : vector<16x16xf32>
    %182 = tpu.matmul %180, %181, %cst_120 {dimension_numbers = #tpu.dot_dimension_numbers<[1], [0], [0], [1], [0, 0, 1, 1], [], []>} : vector<16x16xbf16>, vector<16x16xbf16>, vector<16x16xf32> -> vector<16x16xf32>
    %c0_121 = arith.constant 0 : index
    %c16 = arith.constant 16 : index
    %c0_122 = arith.constant 0 : index
    %183 = vector.load %arg6[%c0_121, %c16, %c0_122] : memref<2x32x32xbf16, #tpu.memory_space<vmem>>, vector<1x16x32xbf16>
    %184 = vector.shape_cast %183 : vector<1x16x32xbf16> to vector<16x32xbf16>
    %185 = arith.truncf %182 : vector<16x16xf32> to vector<16x16xbf16>
    %cst_123 = arith.constant dense<0.000000e+00> : vector<16x32xf32>
    %186 = tpu.matmul %185, %184, %cst_123 {dimension_numbers = #tpu.dot_dimension_numbers<[1], [0], [0], [1], [0, 0, 1, 1], [], []>} : vector<16x16xbf16>, vector<16x32xbf16>, vector<16x32xf32> -> vector<16x32xf32>
    %187 = arith.addf %162, %186 : vector<16x32xf32>
    %c5_124 = arith.constant 5 : index
    %c0_125 = arith.constant 0 : index
    %188 = vector.load %arg9[%c5_124, %c0_125] : memref<20x128xf32, #tpu.memory_space<vmem>>, vector<1x32xf32>
    %189 = vector.broadcast %188 : vector<1x32xf32> to vector<16x32xf32>
    %190 = arith.addf %187, %189 : vector<16x32xf32>
    %191 = arith.addf %190, %120 : vector<16x32xf32>
    %c6_126 = arith.constant 6 : index
    %c0_127 = arith.constant 0 : index
    %192 = vector.load %arg9[%c6_126, %c0_127] : memref<20x128xf32, #tpu.memory_space<vmem>>, vector<1x32xf32>
    %c7_128 = arith.constant 7 : index
    %c0_129 = arith.constant 0 : index
    %193 = vector.load %arg9[%c7_128, %c0_129] : memref<20x128xf32, #tpu.memory_space<vmem>>, vector<1x32xf32>
    %cst_130 = arith.constant dense<0.000000e+00> : vector<16xf32>
    %194 = vector.multi_reduction <add>, %191, %cst_130 [1] : vector<16x32xf32> to vector<16xf32>
    %195 = vector.shape_cast %194 : vector<16xf32> to vector<16x1xf32>
    %cst_131 = arith.constant 3.200000e+01 : f32
    %196 = vector.broadcast %cst_131 : f32 to vector<16x1xf32>
    %197 = arith.divf %195, %196 : vector<16x1xf32>
    %198 = vector.broadcast %197 : vector<16x1xf32> to vector<16x32xf32>
    %199 = arith.subf %191, %198 : vector<16x32xf32>
    %200 = arith.mulf %199, %199 : vector<16x32xf32>
    %cst_132 = arith.constant dense<0.000000e+00> : vector<16xf32>
    %201 = vector.multi_reduction <add>, %200, %cst_132 [1] : vector<16x32xf32> to vector<16xf32>
    %202 = vector.shape_cast %201 : vector<16xf32> to vector<16x1xf32>
    %cst_133 = arith.constant 3.200000e+01 : f32
    %203 = vector.broadcast %cst_133 : f32 to vector<16x1xf32>
    %204 = arith.divf %202, %203 : vector<16x1xf32>
    %205 = vector.broadcast %197 : vector<16x1xf32> to vector<16x32xf32>
    %206 = arith.subf %191, %205 : vector<16x32xf32>
    %cst_134 = arith.constant 9.99999996E-13 : f32
    %207 = vector.broadcast %cst_134 : f32 to vector<16x1xf32>
    %208 = arith.addf %204, %207 : vector<16x1xf32>
    %209 = math.rsqrt %208 : vector<16x1xf32>
    %210 = vector.broadcast %209 : vector<16x1xf32> to vector<16x32xf32>
    %211 = arith.mulf %206, %210 : vector<16x32xf32>
    %212 = vector.broadcast %192 : vector<1x32xf32> to vector<16x32xf32>
    %213 = arith.mulf %211, %212 : vector<16x32xf32>
    %214 = vector.broadcast %193 : vector<1x32xf32> to vector<16x32xf32>
    %215 = arith.addf %213, %214 : vector<16x32xf32>
    %c0_135 = arith.constant 0 : index
    %c0_136 = arith.constant 0 : index
    %c0_137 = arith.constant 0 : index
    %216 = vector.load %arg7[%c0_135, %c0_136, %c0_137] : memref<2x32x128xbf16, #tpu.memory_space<vmem>>, vector<1x32x128xbf16>
    %217 = vector.shape_cast %216 : vector<1x32x128xbf16> to vector<32x128xbf16>
    %218 = arith.truncf %215 : vector<16x32xf32> to vector<16x32xbf16>
    %cst_138 = arith.constant dense<0.000000e+00> : vector<16x128xf32>
    %219 = tpu.matmul %218, %217, %cst_138 {dimension_numbers = #tpu.dot_dimension_numbers<[1], [0], [0], [1], [0, 0, 1, 1], [], []>} : vector<16x32xbf16>, vector<32x128xbf16>, vector<16x128xf32> -> vector<16x128xf32>
    %c8 = arith.constant 8 : index
    %c0_139 = arith.constant 0 : index
    %220 = vector.load %arg9[%c8, %c0_139] : memref<20x128xf32, #tpu.memory_space<vmem>>, vector<1x128xf32>
    %221 = vector.broadcast %220 : vector<1x128xf32> to vector<16x128xf32>
    %222 = arith.addf %219, %221 : vector<16x128xf32>
    %223 = arith.mulf %222, %222 : vector<16x128xf32>
    %224 = arith.mulf %222, %223 : vector<16x128xf32>
    %cst_140 = arith.constant 4.471500e-02 : f32
    %225 = vector.broadcast %cst_140 : f32 to vector<16x128xf32>
    %226 = arith.mulf %225, %224 : vector<16x128xf32>
    %227 = arith.addf %222, %226 : vector<16x128xf32>
    %cst_141 = arith.constant 0.797884583 : f32
    %228 = vector.broadcast %cst_141 : f32 to vector<16x128xf32>
    %229 = arith.mulf %228, %227 : vector<16x128xf32>
    %230 = math.tanh %229 : vector<16x128xf32>
    %cst_142 = arith.constant 1.000000e+00 : f32
    %231 = vector.broadcast %cst_142 : f32 to vector<16x128xf32>
    %232 = arith.addf %231, %230 : vector<16x128xf32>
    %cst_143 = arith.constant 5.000000e-01 : f32
    %233 = vector.broadcast %cst_143 : f32 to vector<16x128xf32>
    %234 = arith.mulf %233, %232 : vector<16x128xf32>
    %235 = arith.mulf %222, %234 : vector<16x128xf32>
    %c0_144 = arith.constant 0 : index
    %c0_145 = arith.constant 0 : index
    %c0_146 = arith.constant 0 : index
    %236 = vector.load %arg8[%c0_144, %c0_145, %c0_146] : memref<2x128x32xbf16, #tpu.memory_space<vmem>>, vector<1x128x32xbf16>
    %237 = vector.shape_cast %236 : vector<1x128x32xbf16> to vector<128x32xbf16>
    %238 = arith.truncf %235 : vector<16x128xf32> to vector<16x128xbf16>
    %cst_147 = arith.constant dense<0.000000e+00> : vector<16x32xf32>
    %239 = tpu.matmul %238, %237, %cst_147 {dimension_numbers = #tpu.dot_dimension_numbers<[1], [0], [0], [1], [0, 0, 1, 1], [], []>} : vector<16x128xbf16>, vector<128x32xbf16>, vector<16x32xf32> -> vector<16x32xf32>
    %c9 = arith.constant 9 : index
    %c0_148 = arith.constant 0 : index
    %240 = vector.load %arg9[%c9, %c0_148] : memref<20x128xf32, #tpu.memory_space<vmem>>, vector<1x32xf32>
    %241 = vector.broadcast %240 : vector<1x32xf32> to vector<16x32xf32>
    %242 = arith.addf %239, %241 : vector<16x32xf32>
    %243 = arith.addf %242, %215 : vector<16x32xf32>
    %c10 = arith.constant 10 : index
    %c0_149 = arith.constant 0 : index
    %244 = vector.load %arg9[%c10, %c0_149] : memref<20x128xf32, #tpu.memory_space<vmem>>, vector<1x32xf32>
    %c11 = arith.constant 11 : index
    %c0_150 = arith.constant 0 : index
    %245 = vector.load %arg9[%c11, %c0_150] : memref<20x128xf32, #tpu.memory_space<vmem>>, vector<1x32xf32>
    %cst_151 = arith.constant dense<0.000000e+00> : vector<16xf32>
    %246 = vector.multi_reduction <add>, %243, %cst_151 [1] : vector<16x32xf32> to vector<16xf32>
    %247 = vector.shape_cast %246 : vector<16xf32> to vector<16x1xf32>
    %cst_152 = arith.constant 3.200000e+01 : f32
    %248 = vector.broadcast %cst_152 : f32 to vector<16x1xf32>
    %249 = arith.divf %247, %248 : vector<16x1xf32>
    %250 = vector.broadcast %249 : vector<16x1xf32> to vector<16x32xf32>
    %251 = arith.subf %243, %250 : vector<16x32xf32>
    %252 = arith.mulf %251, %251 : vector<16x32xf32>
    %cst_153 = arith.constant dense<0.000000e+00> : vector<16xf32>
    %253 = vector.multi_reduction <add>, %252, %cst_153 [1] : vector<16x32xf32> to vector<16xf32>
    %254 = vector.shape_cast %253 : vector<16xf32> to vector<16x1xf32>
    %cst_154 = arith.constant 3.200000e+01 : f32
    %255 = vector.broadcast %cst_154 : f32 to vector<16x1xf32>
    %256 = arith.divf %254, %255 : vector<16x1xf32>
    %257 = vector.broadcast %249 : vector<16x1xf32> to vector<16x32xf32>
    %258 = arith.subf %243, %257 : vector<16x32xf32>
    %cst_155 = arith.constant 9.99999996E-13 : f32
    %259 = vector.broadcast %cst_155 : f32 to vector<16x1xf32>
    %260 = arith.addf %256, %259 : vector<16x1xf32>
    %261 = math.rsqrt %260 : vector<16x1xf32>
    %262 = vector.broadcast %261 : vector<16x1xf32> to vector<16x32xf32>
    %263 = arith.mulf %258, %262 : vector<16x32xf32>
    %264 = vector.broadcast %244 : vector<1x32xf32> to vector<16x32xf32>
    %265 = arith.mulf %263, %264 : vector<16x32xf32>
    %266 = vector.broadcast %245 : vector<1x32xf32> to vector<16x32xf32>
    %267 = arith.addf %265, %266 : vector<16x32xf32>
    %c1_156 = arith.constant 1 : index
    %c0_157 = arith.constant 0 : index
    %c0_158 = arith.constant 0 : index
    %268 = vector.load %arg5[%c1_156, %c0_157, %c0_158] : memref<2x32x96xbf16, #tpu.memory_space<vmem>>, vector<1x32x96xbf16>
    %269 = vector.shape_cast %268 : vector<1x32x96xbf16> to vector<32x96xbf16>
    %270 = arith.truncf %267 : vector<16x32xf32> to vector<16x32xbf16>
    %cst_159 = arith.constant dense<0.000000e+00> : vector<16x96xf32>
    %271 = tpu.matmul %270, %269, %cst_159 {dimension_numbers = #tpu.dot_dimension_numbers<[1], [0], [0], [1], [0, 0, 1, 1], [], []>} : vector<16x32xbf16>, vector<32x96xbf16>, vector<16x96xf32> -> vector<16x96xf32>
    %c12 = arith.constant 12 : index
    %c0_160 = arith.constant 0 : index
    %272 = vector.load %arg9[%c12, %c0_160] : memref<20x128xf32, #tpu.memory_space<vmem>>, vector<1x96xf32>
    %273 = vector.broadcast %272 : vector<1x96xf32> to vector<16x96xf32>
    %274 = arith.addf %271, %273 : vector<16x96xf32>
    %cst_161 = arith.constant 0.000000e+00 : f32
    %275 = vector.broadcast %cst_161 : f32 to vector<16x32xf32>
    %276 = vector.extract_strided_slice %274 {offsets = [0, 0], sizes = [16, 16], strides = [1, 1]} : vector<16x96xf32> to vector<16x16xf32>
    %277 = vector.extract_strided_slice %274 {offsets = [0, 32], sizes = [16, 16], strides = [1, 1]} : vector<16x96xf32> to vector<16x16xf32>
    %278 = vector.extract_strided_slice %274 {offsets = [0, 64], sizes = [16, 16], strides = [1, 1]} : vector<16x96xf32> to vector<16x16xf32>
    %279 = arith.truncf %276 : vector<16x16xf32> to vector<16x16xbf16>
    %280 = arith.truncf %277 : vector<16x16xf32> to vector<16x16xbf16>
    %cst_162 = arith.constant dense<0.000000e+00> : vector<16x16xf32>
    %281 = tpu.matmul %279, %280, %cst_162 {dimension_numbers = #tpu.dot_dimension_numbers<[1], [1], [0], [0], [0, 0, 1, 0], [], []>} : vector<16x16xbf16>, vector<16x16xbf16>, vector<16x16xf32> -> vector<16x16xf32>
    %282 = arith.addf %281, %129 : vector<16x16xf32>
    %cst_163 = arith.constant dense<0xFF800000> : vector<16xf32>
    %283 = vector.multi_reduction <maximumf>, %282, %cst_163 [1] : vector<16x16xf32> to vector<16xf32>
    %284 = vector.shape_cast %283 : vector<16xf32> to vector<16x1xf32>
    %285 = vector.broadcast %284 : vector<16x1xf32> to vector<16x16xf32>
    %286 = arith.subf %282, %285 : vector<16x16xf32>
    %287 = math.exp %286 : vector<16x16xf32>
    %cst_164 = arith.constant dense<0.000000e+00> : vector<16xf32>
    %288 = vector.multi_reduction <add>, %287, %cst_164 [1] : vector<16x16xf32> to vector<16xf32>
    %289 = vector.shape_cast %288 : vector<16xf32> to vector<16x1xf32>
    %290 = tpu.reciprocal %289 {approx = true} : vector<16x1xf32> -> vector<16x1xf32>
    %291 = vector.broadcast %290 : vector<16x1xf32> to vector<16x16xf32>
    %292 = arith.mulf %287, %291 : vector<16x16xf32>
    %293 = arith.truncf %292 : vector<16x16xf32> to vector<16x16xbf16>
    %294 = arith.truncf %278 : vector<16x16xf32> to vector<16x16xbf16>
    %cst_165 = arith.constant dense<0.000000e+00> : vector<16x16xf32>
    %295 = tpu.matmul %293, %294, %cst_165 {dimension_numbers = #tpu.dot_dimension_numbers<[1], [0], [0], [1], [0, 0, 1, 1], [], []>} : vector<16x16xbf16>, vector<16x16xbf16>, vector<16x16xf32> -> vector<16x16xf32>
    %c1_166 = arith.constant 1 : index
    %c0_167 = arith.constant 0 : index
    %c0_168 = arith.constant 0 : index
    %296 = vector.load %arg6[%c1_166, %c0_167, %c0_168] : memref<2x32x32xbf16, #tpu.memory_space<vmem>>, vector<1x16x32xbf16>
    %297 = vector.shape_cast %296 : vector<1x16x32xbf16> to vector<16x32xbf16>
    %298 = arith.truncf %295 : vector<16x16xf32> to vector<16x16xbf16>
    %cst_169 = arith.constant dense<0.000000e+00> : vector<16x32xf32>
    %299 = tpu.matmul %298, %297, %cst_169 {dimension_numbers = #tpu.dot_dimension_numbers<[1], [0], [0], [1], [0, 0, 1, 1], [], []>} : vector<16x16xbf16>, vector<16x32xbf16>, vector<16x32xf32> -> vector<16x32xf32>
    %300 = arith.addf %275, %299 : vector<16x32xf32>
    %301 = vector.extract_strided_slice %274 {offsets = [0, 16], sizes = [16, 16], strides = [1, 1]} : vector<16x96xf32> to vector<16x16xf32>
    %302 = vector.extract_strided_slice %274 {offsets = [0, 48], sizes = [16, 16], strides = [1, 1]} : vector<16x96xf32> to vector<16x16xf32>
    %303 = vector.extract_strided_slice %274 {offsets = [0, 80], sizes = [16, 16], strides = [1, 1]} : vector<16x96xf32> to vector<16x16xf32>
    %304 = arith.truncf %301 : vector<16x16xf32> to vector<16x16xbf16>
    %305 = arith.truncf %302 : vector<16x16xf32> to vector<16x16xbf16>
    %cst_170 = arith.constant dense<0.000000e+00> : vector<16x16xf32>
    %306 = tpu.matmul %304, %305, %cst_170 {dimension_numbers = #tpu.dot_dimension_numbers<[1], [1], [0], [0], [0, 0, 1, 0], [], []>} : vector<16x16xbf16>, vector<16x16xbf16>, vector<16x16xf32> -> vector<16x16xf32>
    %307 = arith.addf %306, %129 : vector<16x16xf32>
    %cst_171 = arith.constant dense<0xFF800000> : vector<16xf32>
    %308 = vector.multi_reduction <maximumf>, %307, %cst_171 [1] : vector<16x16xf32> to vector<16xf32>
    %309 = vector.shape_cast %308 : vector<16xf32> to vector<16x1xf32>
    %310 = vector.broadcast %309 : vector<16x1xf32> to vector<16x16xf32>
    %311 = arith.subf %307, %310 : vector<16x16xf32>
    %312 = math.exp %311 : vector<16x16xf32>
    %cst_172 = arith.constant dense<0.000000e+00> : vector<16xf32>
    %313 = vector.multi_reduction <add>, %312, %cst_172 [1] : vector<16x16xf32> to vector<16xf32>
    %314 = vector.shape_cast %313 : vector<16xf32> to vector<16x1xf32>
    %315 = tpu.reciprocal %314 {approx = true} : vector<16x1xf32> -> vector<16x1xf32>
    %316 = vector.broadcast %315 : vector<16x1xf32> to vector<16x16xf32>
    %317 = arith.mulf %312, %316 : vector<16x16xf32>
    %318 = arith.truncf %317 : vector<16x16xf32> to vector<16x16xbf16>
    %319 = arith.truncf %303 : vector<16x16xf32> to vector<16x16xbf16>
    %cst_173 = arith.constant dense<0.000000e+00> : vector<16x16xf32>
    %320 = tpu.matmul %318, %319, %cst_173 {dimension_numbers = #tpu.dot_dimension_numbers<[1], [0], [0], [1], [0, 0, 1, 1], [], []>} : vector<16x16xbf16>, vector<16x16xbf16>, vector<16x16xf32> -> vector<16x16xf32>
    %c1_174 = arith.constant 1 : index
    %c16_175 = arith.constant 16 : index
    %c0_176 = arith.constant 0 : index
    %321 = vector.load %arg6[%c1_174, %c16_175, %c0_176] : memref<2x32x32xbf16, #tpu.memory_space<vmem>>, vector<1x16x32xbf16>
    %322 = vector.shape_cast %321 : vector<1x16x32xbf16> to vector<16x32xbf16>
    %323 = arith.truncf %320 : vector<16x16xf32> to vector<16x16xbf16>
    %cst_177 = arith.constant dense<0.000000e+00> : vector<16x32xf32>
    %324 = tpu.matmul %323, %322, %cst_177 {dimension_numbers = #tpu.dot_dimension_numbers<[1], [0], [0], [1], [0, 0, 1, 1], [], []>} : vector<16x16xbf16>, vector<16x32xbf16>, vector<16x32xf32> -> vector<16x32xf32>
    %325 = arith.addf %300, %324 : vector<16x32xf32>
    %c13 = arith.constant 13 : index
    %c0_178 = arith.constant 0 : index
    %326 = vector.load %arg9[%c13, %c0_178] : memref<20x128xf32, #tpu.memory_space<vmem>>, vector<1x32xf32>
    %327 = vector.broadcast %326 : vector<1x32xf32> to vector<16x32xf32>
    %328 = arith.addf %325, %327 : vector<16x32xf32>
    %329 = arith.addf %328, %267 : vector<16x32xf32>
    %c14 = arith.constant 14 : index
    %c0_179 = arith.constant 0 : index
    %330 = vector.load %arg9[%c14, %c0_179] : memref<20x128xf32, #tpu.memory_space<vmem>>, vector<1x32xf32>
    %c15 = arith.constant 15 : index
    %c0_180 = arith.constant 0 : index
    %331 = vector.load %arg9[%c15, %c0_180] : memref<20x128xf32, #tpu.memory_space<vmem>>, vector<1x32xf32>
    %cst_181 = arith.constant dense<0.000000e+00> : vector<16xf32>
    %332 = vector.multi_reduction <add>, %329, %cst_181 [1] : vector<16x32xf32> to vector<16xf32>
    %333 = vector.shape_cast %332 : vector<16xf32> to vector<16x1xf32>
    %cst_182 = arith.constant 3.200000e+01 : f32
    %334 = vector.broadcast %cst_182 : f32 to vector<16x1xf32>
    %335 = arith.divf %333, %334 : vector<16x1xf32>
    %336 = vector.broadcast %335 : vector<16x1xf32> to vector<16x32xf32>
    %337 = arith.subf %329, %336 : vector<16x32xf32>
    %338 = arith.mulf %337, %337 : vector<16x32xf32>
    %cst_183 = arith.constant dense<0.000000e+00> : vector<16xf32>
    %339 = vector.multi_reduction <add>, %338, %cst_183 [1] : vector<16x32xf32> to vector<16xf32>
    %340 = vector.shape_cast %339 : vector<16xf32> to vector<16x1xf32>
    %cst_184 = arith.constant 3.200000e+01 : f32
    %341 = vector.broadcast %cst_184 : f32 to vector<16x1xf32>
    %342 = arith.divf %340, %341 : vector<16x1xf32>
    %343 = vector.broadcast %335 : vector<16x1xf32> to vector<16x32xf32>
    %344 = arith.subf %329, %343 : vector<16x32xf32>
    %cst_185 = arith.constant 9.99999996E-13 : f32
    %345 = vector.broadcast %cst_185 : f32 to vector<16x1xf32>
    %346 = arith.addf %342, %345 : vector<16x1xf32>
    %347 = math.rsqrt %346 : vector<16x1xf32>
    %348 = vector.broadcast %347 : vector<16x1xf32> to vector<16x32xf32>
    %349 = arith.mulf %344, %348 : vector<16x32xf32>
    %350 = vector.broadcast %330 : vector<1x32xf32> to vector<16x32xf32>
    %351 = arith.mulf %349, %350 : vector<16x32xf32>
    %352 = vector.broadcast %331 : vector<1x32xf32> to vector<16x32xf32>
    %353 = arith.addf %351, %352 : vector<16x32xf32>
    %c1_186 = arith.constant 1 : index
    %c0_187 = arith.constant 0 : index
    %c0_188 = arith.constant 0 : index
    %354 = vector.load %arg7[%c1_186, %c0_187, %c0_188] : memref<2x32x128xbf16, #tpu.memory_space<vmem>>, vector<1x32x128xbf16>
    %355 = vector.shape_cast %354 : vector<1x32x128xbf16> to vector<32x128xbf16>
    %356 = arith.truncf %353 : vector<16x32xf32> to vector<16x32xbf16>
    %cst_189 = arith.constant dense<0.000000e+00> : vector<16x128xf32>
    %357 = tpu.matmul %356, %355, %cst_189 {dimension_numbers = #tpu.dot_dimension_numbers<[1], [0], [0], [1], [0, 0, 1, 1], [], []>} : vector<16x32xbf16>, vector<32x128xbf16>, vector<16x128xf32> -> vector<16x128xf32>
    %c16_190 = arith.constant 16 : index
    %c0_191 = arith.constant 0 : index
    %358 = vector.load %arg9[%c16_190, %c0_191] : memref<20x128xf32, #tpu.memory_space<vmem>>, vector<1x128xf32>
    %359 = vector.broadcast %358 : vector<1x128xf32> to vector<16x128xf32>
    %360 = arith.addf %357, %359 : vector<16x128xf32>
    %361 = arith.mulf %360, %360 : vector<16x128xf32>
    %362 = arith.mulf %360, %361 : vector<16x128xf32>
    %cst_192 = arith.constant 4.471500e-02 : f32
    %363 = vector.broadcast %cst_192 : f32 to vector<16x128xf32>
    %364 = arith.mulf %363, %362 : vector<16x128xf32>
    %365 = arith.addf %360, %364 : vector<16x128xf32>
    %cst_193 = arith.constant 0.797884583 : f32
    %366 = vector.broadcast %cst_193 : f32 to vector<16x128xf32>
    %367 = arith.mulf %366, %365 : vector<16x128xf32>
    %368 = math.tanh %367 : vector<16x128xf32>
    %cst_194 = arith.constant 1.000000e+00 : f32
    %369 = vector.broadcast %cst_194 : f32 to vector<16x128xf32>
    %370 = arith.addf %369, %368 : vector<16x128xf32>
    %cst_195 = arith.constant 5.000000e-01 : f32
    %371 = vector.broadcast %cst_195 : f32 to vector<16x128xf32>
    %372 = arith.mulf %371, %370 : vector<16x128xf32>
    %373 = arith.mulf %360, %372 : vector<16x128xf32>
    %c1_196 = arith.constant 1 : index
    %c0_197 = arith.constant 0 : index
    %c0_198 = arith.constant 0 : index
    %374 = vector.load %arg8[%c1_196, %c0_197, %c0_198] : memref<2x128x32xbf16, #tpu.memory_space<vmem>>, vector<1x128x32xbf16>
    %375 = vector.shape_cast %374 : vector<1x128x32xbf16> to vector<128x32xbf16>
    %376 = arith.truncf %373 : vector<16x128xf32> to vector<16x128xbf16>
    %cst_199 = arith.constant dense<0.000000e+00> : vector<16x32xf32>
    %377 = tpu.matmul %376, %375, %cst_199 {dimension_numbers = #tpu.dot_dimension_numbers<[1], [0], [0], [1], [0, 0, 1, 1], [], []>} : vector<16x128xbf16>, vector<128x32xbf16>, vector<16x32xf32> -> vector<16x32xf32>
    %c17 = arith.constant 17 : index
    %c0_200 = arith.constant 0 : index
    %378 = vector.load %arg9[%c17, %c0_200] : memref<20x128xf32, #tpu.memory_space<vmem>>, vector<1x32xf32>
    %379 = vector.broadcast %378 : vector<1x32xf32> to vector<16x32xf32>
    %380 = arith.addf %377, %379 : vector<16x32xf32>
    %381 = arith.addf %380, %353 : vector<16x32xf32>
    %c18 = arith.constant 18 : index
    %c0_201 = arith.constant 0 : index
    %382 = vector.load %arg9[%c18, %c0_201] : memref<20x128xf32, #tpu.memory_space<vmem>>, vector<1x32xf32>
    %c19 = arith.constant 19 : index
    %c0_202 = arith.constant 0 : index
    %383 = vector.load %arg9[%c19, %c0_202] : memref<20x128xf32, #tpu.memory_space<vmem>>, vector<1x32xf32>
    %cst_203 = arith.constant dense<0.000000e+00> : vector<16xf32>
    %384 = vector.multi_reduction <add>, %381, %cst_203 [1] : vector<16x32xf32> to vector<16xf32>
    %385 = vector.shape_cast %384 : vector<16xf32> to vector<16x1xf32>
    %cst_204 = arith.constant 3.200000e+01 : f32
    %386 = vector.broadcast %cst_204 : f32 to vector<16x1xf32>
    %387 = arith.divf %385, %386 : vector<16x1xf32>
    %388 = vector.broadcast %387 : vector<16x1xf32> to vector<16x32xf32>
    %389 = arith.subf %381, %388 : vector<16x32xf32>
    %390 = arith.mulf %389, %389 : vector<16x32xf32>
    %cst_205 = arith.constant dense<0.000000e+00> : vector<16xf32>
    %391 = vector.multi_reduction <add>, %390, %cst_205 [1] : vector<16x32xf32> to vector<16xf32>
    %392 = vector.shape_cast %391 : vector<16xf32> to vector<16x1xf32>
    %cst_206 = arith.constant 3.200000e+01 : f32
    %393 = vector.broadcast %cst_206 : f32 to vector<16x1xf32>
    %394 = arith.divf %392, %393 : vector<16x1xf32>
    %395 = vector.broadcast %387 : vector<16x1xf32> to vector<16x32xf32>
    %396 = arith.subf %381, %395 : vector<16x32xf32>
    %cst_207 = arith.constant 9.99999996E-13 : f32
    %397 = vector.broadcast %cst_207 : f32 to vector<16x1xf32>
    %398 = arith.addf %394, %397 : vector<16x1xf32>
    %399 = math.rsqrt %398 : vector<16x1xf32>
    %400 = vector.broadcast %399 : vector<16x1xf32> to vector<16x32xf32>
    %401 = arith.mulf %396, %400 : vector<16x32xf32>
    %402 = vector.broadcast %382 : vector<1x32xf32> to vector<16x32xf32>
    %403 = arith.mulf %401, %402 : vector<16x32xf32>
    %404 = vector.broadcast %383 : vector<1x32xf32> to vector<16x32xf32>
    %405 = arith.addf %403, %404 : vector<16x32xf32>
    %c0_208 = arith.constant 0 : index
    %c0_209 = arith.constant 0 : index
    %c0_210 = arith.constant 0 : index
    %406 = vector.load %arg10[%c0_208, %c0_209, %c0_210] : memref<2x32x32xbf16, #tpu.memory_space<vmem>>, vector<1x32x32xbf16>
    %407 = vector.shape_cast %406 : vector<1x32x32xbf16> to vector<32x32xbf16>
    %408 = arith.truncf %405 : vector<16x32xf32> to vector<16x32xbf16>
    %cst_211 = arith.constant dense<0.000000e+00> : vector<16x32xf32>
    %409 = tpu.matmul %408, %407, %cst_211 {dimension_numbers = #tpu.dot_dimension_numbers<[1], [0], [0], [1], [0, 0, 1, 1], [], []>} : vector<16x32xbf16>, vector<32x32xbf16>, vector<16x32xf32> -> vector<16x32xf32>
    %c2_212 = arith.constant 2 : index
    %c0_213 = arith.constant 0 : index
    %410 = vector.load %arg9[%c2_212, %c0_213] : memref<20x128xf32, #tpu.memory_space<vmem>>, vector<1x32xf32>
    %411 = vector.broadcast %410 : vector<1x32xf32> to vector<16x32xf32>
    %412 = arith.addf %409, %411 : vector<16x32xf32>
    %413 = math.tanh %412 : vector<16x32xf32>
    %c1_214 = arith.constant 1 : index
    %c0_215 = arith.constant 0 : index
    %c0_216 = arith.constant 0 : index
    %414 = vector.load %arg10[%c1_214, %c0_215, %c0_216] : memref<2x32x32xbf16, #tpu.memory_space<vmem>>, vector<1x32x32xbf16>
    %415 = vector.shape_cast %414 : vector<1x32x32xbf16> to vector<32x32xbf16>
    %416 = arith.truncf %413 : vector<16x32xf32> to vector<16x32xbf16>
    %cst_217 = arith.constant dense<0.000000e+00> : vector<16x32xf32>
    %417 = tpu.matmul %416, %415, %cst_217 {dimension_numbers = #tpu.dot_dimension_numbers<[1], [0], [0], [1], [0, 0, 1, 1], [], []>} : vector<16x32xbf16>, vector<32x32xbf16>, vector<16x32xf32> -> vector<16x32xf32>
    %c3_218 = arith.constant 3 : index
    %c0_219 = arith.constant 0 : index
    %418 = vector.load %arg9[%c3_218, %c0_219] : memref<20x128xf32, #tpu.memory_space<vmem>>, vector<1x32xf32>
    %419 = vector.broadcast %418 : vector<1x32xf32> to vector<16x32xf32>
    %420 = arith.addf %417, %419 : vector<16x32xf32>
    %421 = vector.extract_strided_slice %420 {offsets = [0, 0], sizes = [1, 2], strides = [1, 1]} : vector<16x32xf32> to vector<1x2xf32>
    %422 = vector.extract_strided_slice %420 {offsets = [8, 0], sizes = [1, 2], strides = [1, 1]} : vector<16x32xf32> to vector<1x2xf32>
    %423 = tpu.concatenate %421, %422 in 0 : vector<1x2xf32>, vector<1x2xf32> -> vector<2x2xf32>
    %c0_220 = arith.constant 0 : index
    %c0_221 = arith.constant 0 : index
    %424 = vector.load %arg11[%c0_220, %c0_221] : memref<2x2xf32, #tpu.memory_space<vmem>>, vector<2x2xf32>
    tpu.vector_store %arg11[%c0_220, %c0_221], %423 {strides = array<i32>} : memref<2x2xf32, #tpu.memory_space<vmem>>, vector<2x2xf32>,
    return
  }
}

</mosaic_0001>

<bundles_post_ra>
// kernel: classification_bert_forward.1
= control target key start
LH: loop header
LB: loop body
LE: loop exit
PB: predicated region body
PF: predicated region fallthrough
CT: control target
= control target key end

     0   :  { %16 = vsyncpa [#allocation4], 0  ;;  %s2963_s0 = inlined_call_operand.vmem [shape: s32[2,8], index: 0, kind: input, shape index: {}]   ;;  %s2964_s1 = inlined_call_operand.vmem [shape: s32[1,16], index: 1, kind: input, shape index: {}]   ;;  %s2965_s2 = inlined_call_operand.vmem [shape: f32[16,16], index: 2, kind: input, shape index: {}]   ;;  %s2966_s3 = inlined_call_operand.vmem [shape: f32[50,1,32], index: 3, kind: input, shape index: {}]   ;;  %s2967_s4 = inlined_call_operand.vmem [shape: f32[16,32], index: 4, kind: input, shape index: {}]   ;;  %s2968_s5 = inlined_call_operand.vmem [shape: bf16[2,32,96], index: 5, kind: input, shape index: {}]   ;;  %s2969_s6 = inlined_call_operand.vmem [shape: bf16[2,32,32], index: 6, kind: input, shape index: {}]   ;;  %s2970_s7 = inlined_call_operand.vmem [shape: bf16[2,32,128], index: 7, kind: input, shape index: {}]   ;;  %s2971_s8 = inlined_call_operand.vmem [shape: bf16[2,128,32], index: 8, kind: input, shape index: {}]   ;;  %s2972_s9 = inlined_call_operand.vmem [shape: f32[20,128], index: 9, kind: input, shape index: {}]   ;;  %s2973_s10 = inlined_call_operand.vmem [shape: bf16[2,32,32], index: 10, kind: input, shape index: {}]   ;;  %s2974_s11 = inlined_call_operand.hbm [shape: f32[2,2], index: 11, kind: output, shape index: {}]  }
   0x1   :  { %17 = vsyncpa [#allocation3], 0  ;;  %s24_s19 = sshll.u32 %s2963_s0, 4  ;;  %s25_s19 = int_to_ptr.vmem [resolvable:$true] %s24_s19 }
   0x2   :  { %s2305_s20 = scalar_lea.vmem %s25_s19, 32  ;;  %p2310_p1 = scmp.lt.s32.totalorder %s25_s19, %s25_s19 }
   0x3   :  { %p2306_p0 = scmp.ne.s32.totalorder %s25_s19, %s2305_s20  ;;  %p2311_p2 = scmp.lt.s32.totalorder %s2305_s20, %s2305_s20 }
   0x5   :  { %p2312_p3 = por %p2311_p2, %p2310_p1 }
   0x7   :  { %p2313_p4 = pnand %p2312_p3, %p2306_p0 }
   0x9   :  { %2316 = shalt.err (!%p2313_p4)
}
   0xa   :  { %s2343_s21 = smov [#allocation2]  }
   0xb   :  { %27 = dma.vmem_to_smem %s25_s19, 32, %s2343_s21, [#allocation4]  }
   0xc   :  { %2339 = dma.done.wait [#allocation4], 32  }
   0xd   :  { %2340 = vsyncadd [#allocation4], 4294967264 }
   0xe   :  { %51 = sfence }
   0xf   :  { %s53_s22 = sld [smem:[#allocation2]]  ;;  %s1863_s23 = sld [smem:[#allocation2 + $0x1]]  ;;  %v126_v0 = vlaneseq  ;;  %v2424_v1 = vld [vmem:[%s2967_s4 + $0x1] sm:$0x1]  ;;  %v2431_v2 = vld [vmem:[%s2967_s4] sm:$0x1] }
  0x10   :  { %s2415_s24 = sld [smem:[#allocation2 + $0x2]]  ;;  %s2417_s25 = sld [smem:[#allocation2 + $0x3]]  ;;  %v2436_v3 = vld [vmem:[%s2967_s4 + $0x2] sm:$0x1]  ;;  %v2445_v4 = vld [vmem:[%s2967_s4 + $0x3] sm:$0x1] }
  0x11   :  { %s2419_s0 = sld [smem:[#allocation2 + $0x4]]  ;;  %s2426_s28 = sld [smem:[#allocation2 + $0x5]]  ;;  %v2450_v5 = vld [vmem:[%s2967_s4 + $0x4] sm:$0x1]  ;;  %v127_v6 = vshrl.u32 %v126_v0, 7  ;;  %vm209_vm0 = vcmask 1040384  }
  0x12   :  { %s2438_s14 = sld [smem:[#allocation2 + $0x6]]  ;;  %s2440_s15 = sld [smem:[#allocation2 + $0x7]]  ;;  %v2461_v7 = vld [vmem:[%s2967_s4 + $0x5] sm:$0x1]  ;;  %vm211_vm1 = vcmask 1041408   ;;  %vm213_vm2 = vcmask 1042432  }
  0x13   :  { %vm215_vm3 = vcmask 1043456   ;;  %vm217_vm4 = vcmask 1044480   ;;  %v2470_v10 = vld [vmem:[%s2967_s4 + $0x6] sm:$0x1]  ;;  %v2475_v11 = vld [vmem:[%s2967_s4 + $0x7] sm:$0x1] }
  0x14   :  { %v2477_v12 = vsub.s32 0, %v127_v6  ;;  %vm219_vm5 = vcmask 1045504   ;;  %vm221_vm6 = vcmask 1046528   ;;  %vm232_vm7 = vcmask 261120   ;;  %s2494_s16 = sld [smem:[#allocation2 + $0x80]]  ;;  %s1875_s20 = sld [smem:[#allocation2 + $0x85]] }
  0x15   :  { %s54_s26 = scalar_lea.vmem %s2966_s3, %s53_s22  ;;  %s59_s30 = scalar_lea.vmem %s2966_s3, %s1863_s23  ;;  %vm2345_vm8 = vmmov 0   ;;  %vm356_vm9 = vcmask 130048   ;;  %vm1830_vm10 = vcmask 9216  }
  0x16   :  { %v55_v8 = vld [vmem:[%s54_s26] sm:$0x1]  ;;  %s64_s17 = scalar_lea.vmem %s2966_s3, %s2415_s24  ;;  %s69_s26 = scalar_lea.vmem %s2966_s3, %s2417_s25 }
  0x17   :  { %v60_v9 = vld [vmem:[%s59_s30] sm:$0x1]  ;;  %s74_s30 = scalar_lea.vmem %s2966_s3, %s2419_s0  ;;  %v57_v15 = vadd.f32 %v2431_v2, %v55_v8  ;;  %s79_s13 = scalar_lea.vmem %s2966_s3, %s2426_s28 }
  0x18   :  { %v62_v13 = vadd.f32 %v2424_v1, %v60_v9  ;;  %v65_v14 = vld [vmem:[%s64_s17] sm:$0x1]  ;;  %s84_s22 = scalar_lea.vmem %s2966_s3, %s2438_s14  ;;  %s89_s19 = scalar_lea.vmem %s2966_s3, %s2440_s15 }
  0x19   :  { %v67_v16 = vadd.f32 %v2436_v3, %v65_v14  ;;  %v70_v17 = vld [vmem:[%s69_s26] sm:$0x1]  ;;  %s1871_s28 = sld [smem:[#allocation2 + $0x81]]  ;;  %s1872_s14 = sld [smem:[#allocation2 + $0x82]] }
  0x1a   :  { %v75_v18 = vld [vmem:[%s74_s30] sm:$0x1]  ;;  %v72_v19 = vadd.f32 %v2445_v4, %v70_v17  ;;  %v129_v22 = vrot.slane %v62_v13, %v2477_v12  ;;  %s1873_s15 = sld [smem:[#allocation2 + $0x83]]  ;;  %s1874_s23 = sld [smem:[#allocation2 + $0x84]] }
  0x1b   :  { %v77_v20 = vadd.f32 %v2450_v5, %v75_v18  ;;  %v80_v21 = vld [vmem:[%s79_s13] sm:$0x1]  ;;  %v135_v26 = vrot.slane %v67_v16, %v2477_v12  ;;  %s2517_s21 = sld [smem:[#allocation2 + $0x86]]  ;;  %s2519_s24 = sld [smem:[#allocation2 + $0x87]] }
  0x1c   :  { %v82_v23 = vadd.f32 %v2461_v7, %v80_v21  ;;  %v85_v24 = vld [vmem:[%s84_s22] sm:$0x1]  ;;  %v141_v29 = vrot.slane %v72_v19, %v2477_v12  ;;  %v210_v32 = vsel %vm209_vm0, %v57_v15, %v129_v22  ;;  %s94_s29 = scalar_lea.vmem %s2966_s3, %s2494_s16  ;;  %v2344_v21 = vmov 0.0   ;;  %v2210_v22 = vld [vmem:[%s2968_s5 + $0x8] sm:$0xff]   ;;  %s2346_s18 = smov 80  }
  0x1d   :  { %v90_v25 = vld [vmem:[%s89_s19] sm:$0x1]  ;;  %v87_v27 = vadd.f32 %v2470_v10, %v85_v24  ;;  %v147_v30 = vrot.slane %v77_v20, %v2477_v12  ;;  %v212_v34 = vsel %vm211_vm1, %v210_v32, %v135_v26  ;;  %2040 = vmatprep.subr.bf16.mxu1 %v2344_v21  ;;  %2054 = vmatprep.subr.bf16.mxu0 %v2344_v21  ;;  %s2347_s19 = smov 96   ;;  %s2351_s4 = smov [#allocation5]  }
  0x1e   :  { %v92_v28 = vadd.f32 %v2475_v11, %v90_v25  ;;  %v153_v31 = vrot.slane %v82_v23, %v2477_v12  ;;  %v214_v36 = vsel %vm213_vm2, %v212_v34, %v141_v29  ;;  %v95_v38 = vld [vmem:[%s94_s29] sm:$0x1]  ;;  %2044 = vmatprep.mubr.msk.bf16.mxu1 %vm2345_vm8, %v2344_v21  ;;  %2056 = vmatprep.mubr.msk.bf16.mxu0 %vm2345_vm8, %v2344_v21 }
  0x1f   :  { %v159_v33 = vrot.slane %v87_v27, %v2477_v12  ;;  %v216_v37 = vsel %vm215_vm3, %v214_v36, %v147_v30  ;;  %s98_s12 = scalar_lea.vmem %s2966_s3, %s1871_s28  ;;  %s102_s0 = scalar_lea.vmem %s2966_s3, %s1872_s14  ;;  %v96_v43 = vadd.f32 %v95_v38, %v2431_v2  ;;  %v2209_v20 = vld [vmem:[%s2968_s5] sm:$0xff]  }
  0x20   :  { %v165_v35 = vrot.slane %v92_v28, %v2477_v12  ;;  %v218_v39 = vsel %vm217_vm4, %v216_v37, %v153_v31  ;;  %v99_v41 = vld [vmem:[%s98_s12] sm:$0x1]  ;;  %s106_s17 = scalar_lea.vmem %s2966_s3, %s1873_s15  ;;  %s110_s28 = scalar_lea.vmem %s2966_s3, %s1874_s23  ;;  %2041 = vmatpush3.bf16.msra.mxu1 %v2209_v20 }
  0x21   :  { %v220_v40 = vsel %vm219_vm5, %v218_v39, %v159_v33  ;;  %v100_v44 = vadd.f32 %v99_v41, %v2424_v1  ;;  %v103_v45 = vld [vmem:[%s102_s0] sm:$0x1]  ;;  %s114_s14 = scalar_lea.vmem %s2966_s3, %s1875_s20  ;;  %s118_s30 = scalar_lea.vmem %s2966_s3, %s2517_s21  ;;  %2042 = vmatprep.subr.bf16.mxu1 %v2344_v21 }
  0x22   :  { %v222_v42 = vsel %vm221_vm6, %v220_v40, %v165_v35  ;;  %v107_v46 = vld [vmem:[%s106_s17] sm:$0x1]  ;;  %v104_v48 = vadd.f32 %v103_v45, %v2436_v3  ;;  %s122_s23 = scalar_lea.vmem %s2966_s3, %s2519_s24  ;;  %v1879_v35 = vld [vmem:[%s2972_s9 + $0x1] ss:$0 sm:$0xff]  ;;  %v1880_v40 = vld [vmem:[%s2972_s9 + $0x4] ss:$0 sm:$0xff] }
  0x23   :  { %v233_v47 = vsel %vm232_vm7, %v222_v42, 0.0  ;;  %v108_v49 = vadd.f32 %v107_v46, %v2445_v4  ;;  %v111_v50 = vld [vmem:[%s110_s28] sm:$0x1]  ;;  %v171_v56 = vrot.slane %v100_v44, %v2477_v12  ;;  %s2348_s28 = smov 112   ;;  %s1838_s12 = sshll.u32 %s2351_s4, 4  ;;  %s1839_s12 = int_to_ptr.vmem [resolvable:$true] %s1838_s12 }
  0x24   :  { %v115_v51 = vld [vmem:[%s114_s14] sm:$0x1]  ;;  %234 = vadd.xlane.f32.xlu0 %v233_v47  ;;  %v112_v52 = vadd.f32 %v111_v50, %v2450_v5  ;;  %v177_v59 = vrot.slane %v104_v48, %v2477_v12  ;;  %2043 = vmatpush3.bf16.msra.mxu1 %v2210_v22  ;;  %p2322_p6 = scmp.lt.s32.totalorder %s1839_s12, %s1839_s12 }
  0x25   :  { %v116_v53 = vadd.f32 %v115_v51, %v2461_v7  ;;  %v119_v54 = vld [vmem:[%s118_s30] sm:$0x1]  ;;  %v183_v60 = vrot.slane %v108_v49, %v2477_v12  ;;  %v223_v63 = vsel %vm209_vm0, %v96_v43, %v171_v56  ;;  %2048 = vmatprep.subr.bf16.mxu1 %v2344_v21 }
  0x26   :  { %v123_v55 = vld [vmem:[%s122_s23] sm:$0x1]  ;;  %v120_v57 = vadd.f32 %v119_v54, %v2470_v10  ;;  %v189_v61 = vrot.slane %v112_v52, %v2477_v12  ;;  %v224_v1 = vsel %vm211_vm1, %v223_v63, %v177_v59  ;;  %v277_v59 = vld [vmem:[%s2965_s2 + $0x8] sm:$0xff] }
  0x27   :  { %v124_v58 = vadd.f32 %v123_v55, %v2475_v11  ;;  %v195_v62 = vrot.slane %v116_v53, %v2477_v12  ;;  %v225_v3 = vsel %vm213_vm2, %v224_v1, %v183_v60  ;;  %v1878_v31 = vld [vmem:[%s2972_s9] ss:$0 sm:$0xff] }
  0x28   :  { %v201_v0 = vrot.slane %v120_v57, %v2477_v12  ;;  %v226_v4 = vsel %vm215_vm3, %v225_v3, %v189_v61  ;;  %v272_v53 = vld [vmem:[%s2964_s1] sm:$0x1]  ;;  %s2349_s1 = smov 64  }
  0x29   :  { %v207_v2 = vrot.slane %v124_v58, %v2477_v12  ;;  %v227_v5 = vsel %vm217_vm4, %v226_v4, %v195_v62  ;;  %v273_v54 = vcvt.s32.f32 %v272_v53  ;;  %v276_v58 = vld [vmem:[%s2965_s2] sm:$0xff]  ;;  %s2350_s2 = smov 48  }
  0x2a   :  { %v228_v6 = vsel %vm219_vm5, %v227_v5, %v201_v0  ;;  %v2211_v53 = vld [vmem:[%s2969_s6] sm:$0xff]  }
  0x2b   :  { %v229_v7 = vsel %vm221_vm6, %v228_v6, %v207_v2  ;;  %v274_v55 = vsub.f32 1.0, %v273_v54  ;;  %v2212_v54 = vld [vmem:[%s2969_s6 + $0x8] sm:$0xff]  }
  0x2c   :  { %v236_v8 = vsel %vm232_vm7, %v229_v7, 0.0 }
  0x2d   :  { %237 = vadd.xlane.f32.xlu0 %v236_v8  ;;  %v275_v56 = vmul.f32 -10000.0, %v274_v55 }
  0x2f   :  { %v282_v57 = vrot.slane %v275_v56, %v2477_v12 }
  0x31   :  { %v2641_v60 = vadd.f32 %v282_v57, %v276_v58  ;;  %v2643_v61 = vadd.f32 %v282_v57, %v277_v59 }
  0xb1   :  { %v235_v9 = vpop.xlane.xlu0 %234 }
  0xb2   :  { %v240_v10 = vmul.f32 0.03125, %v235_v9 }
  0xb4   :  { %v242_v11 = vsub.f32 %v222_v42, %v240_v10 }
  0xb6   :  { %v244_v13 = vmul.f32 %v242_v11, %v242_v11 }
  0xb8   :  { %v246_v14 = vsel %vm232_vm7, %v244_v13, 0.0 }
  0xb9   :  { %247 = vadd.xlane.f32.xlu1 %v246_v14 }
  0xba   :  { %v238_v15 = vpop.xlane.xlu0 %237 }
  0xbb   :  { %v241_v16 = vmul.f32 0.03125, %v238_v15 }
  0xbd   :  { %v243_v17 = vsub.f32 %v229_v7, %v241_v16 }
  0xbf   :  { %v245_v18 = vmul.f32 %v243_v17, %v243_v17 }
  0xc1   :  { %v249_v19 = vsel %vm232_vm7, %v245_v18, 0.0 }
  0xc2   :  { %250 = vadd.xlane.f32.xlu1 %v249_v19 }
 0x146   :  { %v248_v23 = vpop.xlane.xlu1 %247 }
 0x147   :  { %v252_v24 = vmul.f32 0.03125, %v248_v23 }
 0x149   :  { %v254_v25 = vadd.f32 1e-12, %v252_v24 }
 0x14b   :  { %2241 = vrsqrt.f32 %v254_v25 }
 0x14f   :  { %v251_v26 = vpop.xlane.xlu1 %250 }
 0x150   :  { %v253_v27 = vmul.f32 0.03125, %v251_v26 }
 0x152   :  { %v255_v28 = vadd.f32 1e-12, %v253_v27 }
 0x154   :  { %2243 = vrsqrt.f32 %v255_v28 }
 0x155   :  { %v2242_v29 = vpop.eup %2241 }
 0x156   :  { %v258_v30 = vmul.f32 %v2242_v29, %v242_v11 }
 0x158   :  { %v264_v34 = vmul.f32 %v1878_v31, %v258_v30 }
 0x15a   :  { %v2600_v37 = vadd.f32 %v1879_v35, %v264_v34 }
 0x15e   :  { %v2244_v32 = vpop.eup %2243 }
 0x15f   :  { %v259_v33 = vmul.f32 %v2244_v32, %v243_v17 }
 0x161   :  { %v265_v36 = vmul.f32 %v1878_v31, %v259_v33 }
 0x163   :  { %v2602_v38 = vadd.f32 %v1879_v35, %v265_v36 }
 0x165   :  { %v290_v39 = vpack.c.bf16 %v2602_v38, %v2600_v37 }
 0x167   :  { %2045 = vmatmul.mubr.msk.bf16.vlgmr.msra.gmra.mrb[0].mxu1 %vm232_vm7, %v290_v39 }
 0x168   :  { %2050 = vmatprep.mubr.msk.bf16.mxu1 %vm2345_vm8, %v2344_v21 }
 0x23a   :  { %v345_v41 = vpop.f32.mrb[0].mxu1 }
 0x23b   :  { %v2046_v42 = vpop.f32.mrb[1].mxu1  ;;  %v346_v44 = vadd.f32 %v1880_v40, %v345_v41 }
 0x23c   :  { %v348_v43 = vpop.f32.mrb[2].mxu1 }
 0x23d   :  { %v349_v45 = vadd.f32 %v1880_v40, %v348_v43  ;;  %v2047_v46 = vpop.f32.mrb[3].mxu1 }
 0x23f   :  { %v2612_v47 = vpack.c.bf16 %v349_v45, %v346_v44 }
 0x241   :  { %479 = vrot.lane.b32.xlu1 %v2612_v47, %s2346_s18  ;;  %354 = vrot.lane.b32.xlu0 %v2612_v47, %s2347_s19 }
 0x245   :  { %477 = vrot.lane.b32.xlu1 %v2612_v47, %s2348_s28 }
 0x2b3   :  { %v355_v48 = vpop.permute.xlu0 %354  ;;  %v480_v50 = vpop.permute.xlu1 %479 }
 0x2b4   :  { %v361_v49 = vsel %vm356_vm9, %v355_v48, 0  ;;  %v485_v51 = vsel %vm356_vm9, %v480_v50, 0 }
 0x2b5   :  { %2049 = vmatpush3.bf16.xpose.msra.mxu1 %v361_v49 }
 0x2b6   :  { %2060 = vmatprep.subr.bf16.mxu1 %v2344_v21 }
 0x2b7   :  { %v478_v52 = vpop.permute.xlu1 %477 }
 0x2bc   :  { %2051 = vmatmul.mubr.msk.bf16.vlgmr.msra.gmra.mrb[4].mxu1 %vm356_vm9, %v2612_v47 }
 0x2bd   :  { %2061 = vmatpush3.bf16.xpose.msra.mxu1 %v485_v51  ;;  %2062 = vmatprep.mubr.msk.bf16.mxu1 %vm2345_vm8, %v2344_v21 }
 0x2be   :  { %2072 = vmatprep.subr.bf16.mxu1 %v2344_v21 }
 0x2c4   :  { %2063 = vmatmul.mubr.msk.bf16.vlgmr.msra.gmra.mrb[8].mxu1 %vm356_vm9, %v478_v52 }
 0x2c5   :  { %2074 = vmatprep.mubr.msk.bf16.mxu1 %vm2345_vm8, %v2344_v21  ;;  %2073 = vmatpush3.bf16.msra.mxu1 %v2212_v54  ;;  %v2219_v54 = vld [vmem:[%s2971_s8 + $0x20] sm:$0xff]  }
 0x2c6   :  { %2084 = vmatprep.subr.bf16.mxu1 %v2344_v21 }
 0x38f   :  { %v397_v62 = vpop.f32.mrb[4].mxu1 }
 0x390   :  { %v398_v63 = vadd.f32 %v397_v62, %v2641_v60  ;;  %v2052_v0 = vpop.f32.mrb[5].mxu1 }
 0x391   :  { %v400_v1 = vpop.f32.mrb[6].mxu1 }
 0x392   :  { %v401_v2 = vadd.f32 %v400_v1, %v2643_v61  ;;  %v2053_v12 = vpop.f32.mrb[7].mxu1  ;;  %v404_v3 = vsel %vm356_vm9, %v398_v63, -inf }
 0x393   :  { %405 = vmax.xlane.f32.xlu1 %v404_v3 }
 0x394   :  { %v407_v4 = vsel %vm356_vm9, %v401_v2, -inf }
 0x395   :  { %408 = vmax.xlane.f32.xlu0 %v407_v4 }
 0x397   :  { %v521_v5 = vpop.f32.mrb[8].mxu1 }
 0x398   :  { %v522_v6 = vadd.f32 %v521_v5, %v2641_v60  ;;  %v2064_v7 = vpop.f32.mrb[9].mxu1 }
 0x399   :  { %v524_v8 = vpop.f32.mrb[10].mxu1  ;;  %v1892_v7 = vld [vmem:[%s2972_s9 + $0x5] ss:$0 sm:$0xff] }
 0x39a   :  { %v525_v9 = vadd.f32 %v524_v8, %v2643_v61  ;;  %v2065_v10 = vpop.f32.mrb[11].mxu1  ;;  %v528_v11 = vsel %vm356_vm9, %v522_v6, -inf }
 0x39b   :  { %529 = vmax.xlane.f32.xlu0 %v528_v11 }
 0x39c   :  { %v531_v13 = vsel %vm356_vm9, %v525_v9, -inf }
 0x39f   :  { %532 = vmax.xlane.f32.xlu0 %v531_v13 }
 0x420   :  { %v406_v14 = vpop.xlane.xlu1 %405 }
 0x421   :  { %v410_v15 = vsub.f32 %v398_v63, %v406_v14 }
 0x422   :  { %v409_v16 = vpop.xlane.xlu0 %408 }
 0x423   :  { %v412_v17 = vmul.f32 1.442695, %v410_v15  ;;  %v411_v18 = vsub.f32 %v401_v2, %v409_v16 }
 0x425   :  { %2245 = vpow2.f32 %v412_v17  ;;  %v414_v19 = vmul.f32 1.442695, %v411_v18 }
 0x427   :  { %2247 = vpow2.f32 %v414_v19 }
 0x428   :  { %v530_v20 = vpop.xlane.xlu0 %529 }
 0x429   :  { %v534_v22 = vsub.f32 %v522_v6, %v530_v20 }
 0x42b   :  { %v536_v23 = vmul.f32 1.442695, %v534_v22 }
 0x42c   :  { %v533_v24 = vpop.xlane.xlu0 %532 }
 0x42d   :  { %2249 = vpow2.f32 %v536_v23  ;;  %v535_v25 = vsub.f32 %v525_v9, %v533_v24 }
 0x42f   :  { %v2246_v26 = vpop.eup %2245  ;;  %v538_v27 = vmul.f32 1.442695, %v535_v25 }
 0x430   :  { %v416_v28 = vsel %vm356_vm9, %v2246_v26, 0.0 }
 0x431   :  { %v2248_v29 = vpop.eup %2247  ;;  %2251 = vpow2.f32 %v538_v27  ;;  %417 = vadd.xlane.f32.xlu1 %v416_v28 }
 0x432   :  { %v419_v30 = vsel %vm356_vm9, %v2248_v29, 0.0 }
 0x433   :  { %420 = vadd.xlane.f32.xlu0 %v419_v30  ;;  %v2214_v30 = vld [vmem:[%s2970_s7 + $0x8] sm:$0xff]  }
 0x437   :  { %v2250_v31 = vpop.eup %2249 }
 0x438   :  { %v540_v32 = vsel %vm356_vm9, %v2250_v31, 0.0 }
 0x439   :  { %541 = vadd.xlane.f32.xlu1 %v540_v32 }
 0x43b   :  { %v2252_v33 = vpop.eup %2251 }
 0x43c   :  { %v543_v34 = vsel %vm356_vm9, %v2252_v33, 0.0 }
 0x43d   :  { %544 = vadd.xlane.f32.xlu0 %v543_v34 }
 0x44a   :  { %427 = vrot.lane.b32.xlu1 %v2612_v47, %s2349_s1 }
 0x453   :  { %551 = vrot.lane.b32.xlu0 %v2612_v47, %s2350_s2 }
 0x4be   :  { %v418_v35 = vpop.xlane.xlu1 %417 }
 0x4bf   :  { %2253 = vrcp.f32 %v418_v35 }
 0x4c0   :  { %v421_v36 = vpop.xlane.xlu0 %420 }
 0x4c1   :  { %2255 = vrcp.f32 %v421_v36 }
 0x4c6   :  { %v542_v39 = vpop.xlane.xlu1 %541 }
 0x4c7   :  { %2257 = vrcp.f32 %v542_v39 }
 0x4c9   :  { %v2254_v40 = vpop.eup %2253 }
 0x4ca   :  { %v428_v41 = vpop.permute.xlu1 %427  ;;  %v545_v42 = vpop.xlane.xlu0 %544  ;;  %v424_v44 = vmul.f32 %v2254_v40, %v2246_v26  ;;  %v1893_v40 = vld [vmem:[%s2972_s9 + $0x6] ss:$0 sm:$0xff] }
 0x4cb   :  { %v2256_v43 = vpop.eup %2255  ;;  %2259 = vrcp.f32 %v545_v42  ;;  %2055 = vmatpush3.bf16.msra.mxu0 %v428_v41 }
 0x4cc   :  { %2066 = vmatprep.subr.bf16.mxu0 %v2344_v21  ;;  %v425_v45 = vmul.f32 %v2256_v43, %v2248_v29 }
 0x4ce   :  { %v552_v46 = vpop.permute.xlu0 %551  ;;  %v426_v48 = vpack.c.bf16 %v425_v45, %v424_v44  ;;  %v1894_v45 = vld [vmem:[%s2972_s9 + $0x7] ss:$0 sm:$0xff] }
 0x4d0   :  { %2057 = vmatmul.mubr.msk.bf16.vlgmr.msra.gmra.mrb[0].mxu0 %vm356_vm9, %v426_v48 }
 0x4d1   :  { %2067 = vmatpush3.bf16.msra.mxu0 %v552_v46  ;;  %2068 = vmatprep.mubr.msk.bf16.mxu0 %vm2345_vm8, %v2344_v21  ;;  %v2258_v47 = vpop.eup %2257 }
 0x4d2   :  { %2078 = vmatprep.subr.bf16.mxu0 %v2344_v21  ;;  %v548_v50 = vmul.f32 %v2258_v47, %v2250_v31 }
 0x4d5   :  { %v2260_v49 = vpop.eup %2259 }
 0x4d6   :  { %v549_v51 = vmul.f32 %v2260_v49, %v2252_v33 }
 0x4d8   :  { %v550_v52 = vpack.c.bf16 %v549_v51, %v548_v50  ;;  %v2215_v50 = vld [vmem:[%s2971_s8] sm:$0xff]   ;;  %v2216_v51 = vld [vmem:[%s2971_s8 + $0x8] sm:$0xff]  }
 0x4da   :  { %2069 = vmatmul.mubr.msk.bf16.vlgmr.msra.gmra.mrb[4].mxu0 %vm356_vm9, %v550_v52  ;;  %v2217_v52 = vld [vmem:[%s2971_s8 + $0x10] sm:$0xff]  }
 0x4db   :  { %2080 = vmatprep.mubr.msk.bf16.mxu0 %vm2345_vm8, %v2344_v21  ;;  %2079 = vmatpush3.bf16.msra.mxu0 %v2211_v53  ;;  %v2218_v53 = vld [vmem:[%s2971_s8 + $0x18] sm:$0xff]  }
 0x4dc   :  { %2092 = vmatprep.subr.bf16.mxu0 %v2344_v21 }
 0x5a3   :  { %v467_v55 = vpop.f32.mrb[0].mxu0 }
 0x5a4   :  { %v2058_v56 = vpop.f32.mrb[1].mxu0 }
 0x5a5   :  { %v470_v57 = vpop.f32.mrb[2].mxu0  ;;  %v2221_v56 = vld [vmem:[%s2971_s8 + $0x30] sm:$0xff]  }
 0x5a6   :  { %v476_v58 = vpack.c.bf16 %v470_v57, %v467_v55  ;;  %v2059_v59 = vpop.f32.mrb[3].mxu0  ;;  %v2220_v55 = vld [vmem:[%s2971_s8 + $0x28] sm:$0xff]   ;;  %v2222_v57 = vld [vmem:[%s2971_s8 + $0x38] sm:$0xff]  }
 0x5a8   :  { %2081 = vmatmul.mubr.msk.bf16.vlgmr.msra.gmra.mrb[8].mxu0 %vm356_vm9, %v476_v58  ;;  %v1895_v58 = vld [vmem:[%s2972_s9 + $0x8] ss:$0 sm:$0xff] }
 0x5a9   :  { %2108 = vmatprep.mubr.msk.bf16.mxu0 %vm2345_vm8, %v2344_v21  ;;  %2093 = vmatpush3.bf16.msra.mxu0 %v2215_v50 }
 0x5aa   :  { %2094 = vmatprep.subr.bf16.mxu0 %v2344_v21 }
 0x5ad   :  { %v591_v62 = vpop.f32.mrb[4].mxu0  ;;  %2095 = vmatpush3.bf16.msra.mxu0 %v2216_v51 }
 0x5ae   :  { %v2070_v63 = vpop.f32.mrb[5].mxu0  ;;  %2096 = vmatprep.subr.bf16.mxu0 %v2344_v21 }
 0x5af   :  { %v594_v0 = vpop.f32.mrb[6].mxu0 }
 0x5b0   :  { %v600_v1 = vpack.c.bf16 %v594_v0, %v591_v62  ;;  %v2071_v2 = vpop.f32.mrb[7].mxu0 }
 0x5b1   :  { %2097 = vmatpush3.bf16.msra.mxu0 %v2217_v52 }
 0x5b2   :  { %2075 = vmatmul.mubr.msk.bf16.vlgmr.msra.gmra.mrb[12].mxu1 %vm356_vm9, %v600_v1  ;;  %2098 = vmatprep.subr.bf16.mxu0 %v2344_v21 }
 0x5b3   :  { %2088 = vmatprep.mubr.msk.bf16.mxu1 %vm2345_vm8, %v2344_v21 }
 0x5b5   :  { %2099 = vmatpush3.bf16.msra.mxu0 %v2218_v53  ;;  %v1908_v53 = vld [vmem:[%s2972_s9 + $0xa] ss:$0 sm:$0xff] }
 0x5b6   :  { %2100 = vmatprep.subr.bf16.mxu0 %v2344_v21 }
 0x5b9   :  { %2101 = vmatpush3.bf16.msra.mxu0 %v2219_v54 }
 0x5ba   :  { %2102 = vmatprep.subr.bf16.mxu0 %v2344_v21 }
 0x5bd   :  { %2103 = vmatpush3.bf16.msra.mxu0 %v2220_v55 }
 0x5be   :  { %2104 = vmatprep.subr.bf16.mxu0 %v2344_v21 }
 0x5c1   :  { %2105 = vmatpush3.bf16.msra.mxu0 %v2221_v56 }
 0x5c2   :  { %2106 = vmatprep.subr.bf16.mxu0 %v2344_v21 }
 0x5c5   :  { %2107 = vmatpush3.bf16.msra.mxu0 %v2222_v57 }
 0x5c6   :  { %2138 = vmatprep.subr.bf16.mxu0 %v2344_v21 }
 0x67b   :  { %v694_v12 = vpop.f32.mrb[8].mxu0 }
 0x67c   :  { %v2082_v3 = vpop.f32.mrb[9].mxu0 }
 0x67d   :  { %v697_v4 = vpop.f32.mrb[10].mxu0 }
 0x67e   :  { %v2083_v5 = vpop.f32.mrb[11].mxu0 }
 0x685   :  { %v644_v6 = vpop.f32.mrb[12].mxu1 }
 0x686   :  { %v695_v8 = vadd.f32 %v694_v12, %v644_v6  ;;  %v2076_v9 = vpop.f32.mrb[13].mxu1 }
 0x687   :  { %v647_v10 = vpop.f32.mrb[14].mxu1 }
 0x688   :  { %v706_v11 = vadd.f32 %v1892_v7, %v695_v8  ;;  %v698_v13 = vadd.f32 %v697_v4, %v647_v10  ;;  %v2077_v14 = vpop.f32.mrb[15].mxu1 }
 0x68a   :  { %v707_v15 = vadd.f32 %v1892_v7, %v698_v13  ;;  %v708_v16 = vadd.f32 %v706_v11, %v2600_v37 }
 0x68c   :  { %v712_v17 = vsel %vm232_vm7, %v708_v16, 0.0  ;;  %v709_v18 = vadd.f32 %v707_v15, %v2602_v38  ;;  %v2213_v38 = vld [vmem:[%s2970_s7] sm:$0xff]  }
 0x68d   :  { %713 = vadd.xlane.f32.xlu1 %v712_v17  ;;  %2085 = vmatpush3.bf16.msra.mxu1 %v2213_v38 }
 0x68e   :  { %v715_v19 = vsel %vm232_vm7, %v709_v18, 0.0  ;;  %2086 = vmatprep.subr.bf16.mxu1 %v2344_v21 }
 0x68f   :  { %716 = vadd.xlane.f32.xlu0 %v715_v19 }
 0x691   :  { %2087 = vmatpush3.bf16.msra.mxu1 %v2214_v30 }
 0x692   :  { %2112 = vmatprep.subr.bf16.mxu1 %v2344_v21 }
 0x71a   :  { %v714_v20 = vpop.xlane.xlu1 %713 }
 0x71b   :  { %v718_v22 = vmul.f32 0.03125, %v714_v20 }
 0x71c   :  { %v717_v23 = vpop.xlane.xlu0 %716 }
 0x71d   :  { %v720_v24 = vsub.f32 %v708_v16, %v718_v22  ;;  %v719_v25 = vmul.f32 0.03125, %v717_v23  ;;  %v1899_v23 = vld [vmem:[%s2972_s9 + $0x9] ss:$0 sm:$0xff] }
 0x71f   :  { %v721_v26 = vsub.f32 %v709_v18, %v719_v25  ;;  %v722_v27 = vmul.f32 %v720_v24, %v720_v24 }
 0x721   :  { %v724_v28 = vsel %vm232_vm7, %v722_v27, 0.0  ;;  %v723_v29 = vmul.f32 %v721_v26, %v721_v26 }
 0x722   :  { %725 = vadd.xlane.f32.xlu1 %v724_v28 }
 0x723   :  { %v727_v37 = vsel %vm232_vm7, %v723_v29, 0.0 }
 0x724   :  { %728 = vadd.xlane.f32.xlu0 %v727_v37 }
 0x7af   :  { %v726_v31 = vpop.xlane.xlu1 %725 }
 0x7b0   :  { %v730_v32 = vmul.f32 0.03125, %v726_v31 }
 0x7b1   :  { %v729_v33 = vpop.xlane.xlu0 %728 }
 0x7b2   :  { %v732_v34 = vadd.f32 1e-12, %v730_v32  ;;  %v731_v35 = vmul.f32 0.03125, %v729_v33 }
 0x7b4   :  { %2261 = vrsqrt.f32 %v732_v34  ;;  %v733_v36 = vadd.f32 1e-12, %v731_v35 }
 0x7b6   :  { %2263 = vrsqrt.f32 %v733_v36 }
 0x7be   :  { %v2262_v39 = vpop.eup %2261 }
 0x7bf   :  { %v736_v41 = vmul.f32 %v2262_v39, %v720_v24 }
 0x7c0   :  { %v2264_v42 = vpop.eup %2263 }
 0x7c1   :  { %v742_v43 = vmul.f32 %v1893_v40, %v736_v41  ;;  %v737_v44 = vmul.f32 %v2264_v42, %v721_v26 }
 0x7c3   :  { %v743_v46 = vmul.f32 %v1893_v40, %v737_v44  ;;  %v2706_v48 = vadd.f32 %v1894_v45, %v742_v43  ;;  %v2223_v44 = vld [vmem:[%s2968_s5 + $0x10] sm:$0xff]  }
 0x7c5   :  { %v2708_v47 = vadd.f32 %v1894_v45, %v743_v46  ;;  %v2224_v45 = vld [vmem:[%s2968_s5 + $0x18] sm:$0xff]   ;;  %s2317_s5 = scalar_lea.vmem %s1839_s12, 32 }
 0x7c6   :  { %p2318_p5 = scmp.ne.s32.totalorder %s1839_s12, %s2317_s5  ;;  %p2323_p7 = scmp.lt.s32.totalorder %s2317_s5, %s2317_s5 }
 0x7c7   :  { %v754_v49 = vpack.c.bf16 %v2708_v47, %v2706_v48 }
 0x7c8   :  { %p2324_p8 = por %p2323_p7, %p2322_p6 }
 0x7c9   :  { %2089 = vmatmul.mubr.msk.bf16.vlgmr.msra.gmra.mrb[16].mxu1 %vm232_vm7, %v754_v49 }
 0x7ca   :  { %2116 = vmatprep.mubr.msk.bf16.mxu1 %vm2345_vm8, %v2344_v21  ;;  %2113 = vmatpush3.bf16.msra.mxu1 %v2223_v44  ;;  %p2325_p9 = pnand %p2324_p8, %p2318_p5 }
 0x7cb   :  { %2114 = vmatprep.subr.bf16.mxu1 %v2344_v21 }
 0x7ce   :  { %2115 = vmatpush3.bf16.msra.mxu1 %v2224_v45 }
 0x7cf   :  { %2120 = vmatprep.subr.bf16.mxu1 %v2344_v21 }
 0x89c   :  { %v809_v59 = vpop.f32.mrb[16].mxu1 }
 0x89d   :  { %v810_v62 = vadd.f32 %v1895_v58, %v809_v59  ;;  %v2090_v63 = vpop.f32.mrb[17].mxu1 }
 0x89e   :  { %v812_v0 = vpop.f32.mrb[18].mxu1 }
 0x89f   :  { %v816_v1 = vmul.f32 %v810_v62, %v810_v62  ;;  %v813_v2 = vadd.f32 %v1895_v58, %v812_v0  ;;  %v2091_v12 = vpop.f32.mrb[19].mxu1  ;;  %v1909_v58 = vld [vmem:[%s2972_s9 + $0xb] ss:$0 sm:$0xff] }
 0x8a1   :  { %v818_v3 = vmul.f32 %v816_v1, %v810_v62  ;;  %v817_v4 = vmul.f32 %v813_v2, %v813_v2  ;;  %v1914_v1 = vld [vmem:[%s2972_s9 + $0xc] ss:$0 sm:$0xff] }
 0x8a3   :  { %v820_v5 = vmul.f32 0.044715, %v818_v3  ;;  %v819_v6 = vmul.f32 %v817_v4, %v813_v2 }
 0x8a5   :  { %v822_v7 = vadd.f32 %v820_v5, %v810_v62  ;;  %v821_v8 = vmul.f32 0.044715, %v819_v6 }
 0x8a7   :  { %v824_v9 = vmul.f32 0.7978846, %v822_v7  ;;  %v823_v10 = vadd.f32 %v821_v8, %v813_v2 }
 0x8a9   :  { %2265 = vtanh.f32 %v824_v9  ;;  %v825_v11 = vmul.f32 0.7978846, %v823_v10 }
 0x8ab   :  { %2267 = vtanh.f32 %v825_v11 }
 0x8b3   :  { %v2266_v13 = vpop.eup %2265 }
 0x8b4   :  { %v828_v14 = vadd.f32 1.0, %v2266_v13 }
 0x8b5   :  { %v2268_v15 = vpop.eup %2267 }
 0x8b6   :  { %v830_v16 = vmul.f32 0.5, %v828_v14  ;;  %v829_v17 = vadd.f32 1.0, %v2268_v15 }
 0x8b8   :  { %v831_v18 = vmul.f32 0.5, %v829_v17  ;;  %v832_v19 = vmul.f32 %v830_v16, %v810_v62 }
 0x8ba   :  { %v833_v20 = vmul.f32 %v831_v18, %v813_v2 }
 0x8bc   :  { %v850_v22 = vpack.c.bf16 %v833_v20, %v832_v19 }
 0x8be   :  { %2109 = vmatmul.mubr.bf16.vlgmr.msra.gmra.mrb[12].mxu0 %v850_v22 }
 0x8bf   :  { %2140 = vmatprep.mubr.msk.bf16.mxu0 %vm2345_vm8, %v2344_v21 }
 0x991   :  { %v938_v24 = vpop.f32.mrb[12].mxu0 }
 0x992   :  { %v939_v25 = vadd.f32 %v1899_v23, %v938_v24  ;;  %v2110_v26 = vpop.f32.mrb[13].mxu0 }
 0x993   :  { %v941_v27 = vpop.f32.mrb[14].mxu0 }
 0x994   :  { %v942_v28 = vadd.f32 %v1899_v23, %v941_v27  ;;  %v2111_v29 = vpop.f32.mrb[15].mxu0  ;;  %v945_v37 = vadd.f32 %v939_v25, %v2706_v48 }
 0x996   :  { %v949_v38 = vsel %vm232_vm7, %v945_v37, 0.0  ;;  %v946_v30 = vadd.f32 %v942_v28, %v2708_v47 }
 0x997   :  { %950 = vadd.xlane.f32.xlu1 %v949_v38 }
 0x998   :  { %v952_v31 = vsel %vm232_vm7, %v946_v30, 0.0 }
 0x999   :  { %953 = vadd.xlane.f32.xlu0 %v952_v31 }
 0xa24   :  { %v951_v32 = vpop.xlane.xlu1 %950 }
 0xa25   :  { %v955_v33 = vmul.f32 0.03125, %v951_v32 }
 0xa26   :  { %v954_v34 = vpop.xlane.xlu0 %953 }
 0xa27   :  { %v957_v35 = vsub.f32 %v945_v37, %v955_v33  ;;  %v956_v36 = vmul.f32 0.03125, %v954_v34 }
 0xa29   :  { %v958_v39 = vsub.f32 %v946_v30, %v956_v36  ;;  %v959_v40 = vmul.f32 %v957_v35, %v957_v35 }
 0xa2b   :  { %v961_v41 = vsel %vm232_vm7, %v959_v40, 0.0  ;;  %v960_v42 = vmul.f32 %v958_v39, %v958_v39 }
 0xa2c   :  { %962 = vadd.xlane.f32.xlu1 %v961_v41 }
 0xa2d   :  { %v964_v43 = vsel %vm232_vm7, %v960_v42, 0.0 }
 0xa2e   :  { %965 = vadd.xlane.f32.xlu0 %v964_v43 }
 0xab9   :  { %v963_v46 = vpop.xlane.xlu1 %962 }
 0xaba   :  { %v967_v48 = vmul.f32 0.03125, %v963_v46 }
 0xabb   :  { %v966_v47 = vpop.xlane.xlu0 %965 }
 0xabc   :  { %v969_v49 = vadd.f32 1e-12, %v967_v48  ;;  %v968_v50 = vmul.f32 0.03125, %v966_v47 }
 0xabe   :  { %2269 = vrsqrt.f32 %v969_v49  ;;  %v970_v51 = vadd.f32 1e-12, %v968_v50 }
 0xac0   :  { %2271 = vrsqrt.f32 %v970_v51 }
 0xac8   :  { %v2270_v52 = vpop.eup %2269 }
 0xac9   :  { %v973_v54 = vmul.f32 %v2270_v52, %v957_v35 }
 0xaca   :  { %v2272_v55 = vpop.eup %2271 }
 0xacb   :  { %v979_v56 = vmul.f32 %v1908_v53, %v973_v54  ;;  %v974_v57 = vmul.f32 %v2272_v55, %v958_v39 }
 0xacd   :  { %v980_v59 = vmul.f32 %v1908_v53, %v974_v57  ;;  %v2775_v62 = vadd.f32 %v1909_v58, %v979_v56 }
 0xacf   :  { %v2777_v63 = vadd.f32 %v1909_v58, %v980_v59 }
 0xad1   :  { %v992_v0 = vpack.c.bf16 %v2777_v63, %v2775_v62 }
 0xad3   :  { %2117 = vmatmul.mubr.msk.bf16.vlgmr.msra.gmra.mrb[20].mxu1 %vm232_vm7, %v992_v0 }
 0xad4   :  { %2122 = vmatprep.mubr.msk.bf16.mxu1 %vm2345_vm8, %v2344_v21 }
 0xba6   :  { %v1047_v2 = vpop.f32.mrb[20].mxu1 }
 0xba7   :  { %v2118_v12 = vpop.f32.mrb[21].mxu1  ;;  %v1048_v4 = vadd.f32 %v1914_v1, %v1047_v2  ;;  %v2226_v2 = vld [vmem:[%s2969_s6 + $0x18] sm:$0xff]  }
 0xba8   :  { %v1050_v3 = vpop.f32.mrb[22].mxu1 }
 0xba9   :  { %v1051_v5 = vadd.f32 %v1914_v1, %v1050_v3  ;;  %v2119_v6 = vpop.f32.mrb[23].mxu1 }
 0xbab   :  { %v2787_v7 = vpack.c.bf16 %v1051_v5, %v1048_v4 }
 0xbad   :  { %1056 = vrot.lane.b32.xlu1 %v2787_v7, %s2347_s19 }
 0xbb1   :  { %1128 = vrot.lane.b32.xlu1 %v2787_v7, %s2349_s1 }
 0xbb5   :  { %1179 = vrot.lane.b32.xlu1 %v2787_v7, %s2348_s28 }
 0xc1f   :  { %v1057_v8 = vpop.permute.xlu1 %1056 }
 0xc20   :  { %v1062_v9 = vsel %vm356_vm9, %v1057_v8, 0 }
 0xc21   :  { %2121 = vmatpush3.bf16.xpose.msra.mxu1 %v1062_v9 }
 0xc22   :  { %2126 = vmatprep.subr.bf16.mxu1 %v2344_v21 }
 0xc23   :  { %v1129_v10 = vpop.permute.xlu1 %1128 }
 0xc27   :  { %v1180_v40 = vpop.permute.xlu1 %1179 }
 0xc28   :  { %2123 = vmatmul.mubr.msk.bf16.vlgmr.msra.gmra.mrb[24].mxu1 %vm356_vm9, %v2787_v7 }
 0xc29   :  { %2127 = vmatpush3.bf16.msra.mxu1 %v1129_v10  ;;  %2128 = vmatprep.mubr.msk.bf16.mxu1 %vm2345_vm8, %v2344_v21 }
 0xc2a   :  { %2132 = vmatprep.subr.bf16.mxu1 %v2344_v21 }
 0xcfb   :  { %v1098_v11 = vpop.f32.mrb[24].mxu1 }
 0xcfc   :  { %v1099_v13 = vadd.f32 %v1098_v11, %v2641_v60  ;;  %v2124_v14 = vpop.f32.mrb[25].mxu1 }
 0xcfd   :  { %v1101_v15 = vpop.f32.mrb[26].mxu1 }
 0xcfe   :  { %v1102_v16 = vadd.f32 %v1101_v15, %v2643_v61  ;;  %v2125_v17 = vpop.f32.mrb[27].mxu1  ;;  %v1105_v18 = vsel %vm356_vm9, %v1099_v13, -inf }
 0xcff   :  { %1106 = vmax.xlane.f32.xlu0 %v1105_v18 }
 0xd00   :  { %v1108_v19 = vsel %vm356_vm9, %v1102_v16, -inf }
 0xd03   :  { %1109 = vmax.xlane.f32.xlu0 %v1108_v19 }
 0xd8c   :  { %v1107_v20 = vpop.xlane.xlu0 %1106 }
 0xd8d   :  { %v1111_v22 = vsub.f32 %v1099_v13, %v1107_v20 }
 0xd8f   :  { %v1113_v23 = vmul.f32 1.442695, %v1111_v22 }
 0xd90   :  { %v1110_v24 = vpop.xlane.xlu0 %1109 }
 0xd91   :  { %2273 = vpow2.f32 %v1113_v23  ;;  %v1112_v25 = vsub.f32 %v1102_v16, %v1110_v24  ;;  %v1930_v23 = vld [vmem:[%s2972_s9 + $0xd] ss:$0 sm:$0xff] }
 0xd93   :  { %v1115_v26 = vmul.f32 1.442695, %v1112_v25 }
 0xd95   :  { %2275 = vpow2.f32 %v1115_v26 }
 0xd9b   :  { %v2274_v27 = vpop.eup %2273 }
 0xd9c   :  { %v1117_v28 = vsel %vm356_vm9, %v2274_v27, 0.0 }
 0xd9d   :  { %1118 = vadd.xlane.f32.xlu0 %v1117_v28 }
 0xd9f   :  { %v2276_v29 = vpop.eup %2275 }
 0xda0   :  { %v1120_v37 = vsel %vm356_vm9, %v2276_v29, 0.0 }
 0xda1   :  { %1121 = vadd.xlane.f32.xlu0 %v1120_v37 }
 0xdb7   :  { %1181 = vrot.lane.b32.xlu0 %v2787_v7, %s2346_s18 }
 0xe2a   :  { %v1119_v38 = vpop.xlane.xlu0 %1118 }
 0xe2b   :  { %2277 = vrcp.f32 %v1119_v38 }
 0xe2e   :  { %v1122_v30 = vpop.xlane.xlu0 %1121 }
 0xe2f   :  { %2279 = vrcp.f32 %v1122_v30 }
 0xe32   :  { %v1182_v35 = vpop.permute.xlu0 %1181 }
 0xe33   :  { %v1187_v39 = vsel %vm356_vm9, %v1182_v35, 0 }
 0xe35   :  { %v2278_v31 = vpop.eup %2277 }
 0xe36   :  { %v1125_v33 = vmul.f32 %v2278_v31, %v2274_v27 }
 0xe39   :  { %v2280_v32 = vpop.eup %2279 }
 0xe3a   :  { %v1126_v34 = vmul.f32 %v2280_v32, %v2276_v29 }
 0xe3c   :  { %v1127_v36 = vpack.c.bf16 %v1126_v34, %v1125_v33 }
 0xe3e   :  { %2129 = vmatmul.mubr.msk.bf16.vlgmr.msra.gmra.mrb[28].mxu1 %vm356_vm9, %v1127_v36 }
 0xe3f   :  { %2133 = vmatpush3.bf16.xpose.msra.mxu1 %v1187_v39  ;;  %2134 = vmatprep.mubr.msk.bf16.mxu1 %vm2345_vm8, %v2344_v21 }
 0xe40   :  { %2144 = vmatprep.subr.bf16.mxu1 %v2344_v21 }
 0xe46   :  { %2135 = vmatmul.mubr.msk.bf16.vlgmr.msra.gmra.mrb[32].mxu1 %vm356_vm9, %v1180_v40 }
 0xe47   :  { %2146 = vmatprep.mubr.msk.bf16.mxu1 %vm2345_vm8, %v2344_v21  ;;  %2145 = vmatpush3.bf16.msra.mxu1 %v2226_v2  ;;  %v2231_v2 = vld [vmem:[%s2971_s8 + $0x50] sm:$0xff]  }
 0xe48   :  { %2156 = vmatprep.subr.bf16.mxu1 %v2344_v21 }
 0xf11   :  { %v1168_v41 = vpop.f32.mrb[28].mxu1 }
 0xf12   :  { %v2130_v42 = vpop.f32.mrb[29].mxu1 }
 0xf13   :  { %v1171_v43 = vpop.f32.mrb[30].mxu1 }
 0xf14   :  { %v1178_v44 = vpack.c.bf16 %v1171_v43, %v1168_v41  ;;  %v2131_v45 = vpop.f32.mrb[31].mxu1 }
 0xf19   :  { %v1223_v46 = vpop.f32.mrb[32].mxu1 }
 0xf1a   :  { %v1224_v48 = vadd.f32 %v1223_v46, %v2641_v60  ;;  %v2136_v47 = vpop.f32.mrb[33].mxu1 }
 0xf1b   :  { %v1226_v49 = vpop.f32.mrb[34].mxu1 }
 0xf1c   :  { %v1227_v50 = vadd.f32 %v1226_v49, %v2643_v61  ;;  %v2137_v51 = vpop.f32.mrb[35].mxu1  ;;  %v1230_v52 = vsel %vm356_vm9, %v1224_v48, -inf }
 0xf1d   :  { %1231 = vmax.xlane.f32.xlu1 %v1230_v52 }
 0xf1e   :  { %v1233_v53 = vsel %vm356_vm9, %v1227_v50, -inf }
 0xf1f   :  { %1234 = vmax.xlane.f32.xlu0 %v1233_v53  ;;  %v1931_v53 = vld [vmem:[%s2972_s9 + $0xe] ss:$0 sm:$0xff] }
 0xfaa   :  { %v1232_v54 = vpop.xlane.xlu1 %1231 }
 0xfab   :  { %v1236_v55 = vsub.f32 %v1224_v48, %v1232_v54 }
 0xfac   :  { %v1235_v56 = vpop.xlane.xlu0 %1234 }
 0xfad   :  { %v1238_v57 = vmul.f32 1.442695, %v1236_v55  ;;  %v1237_v58 = vsub.f32 %v1227_v50, %v1235_v56 }
 0xfaf   :  { %2281 = vpow2.f32 %v1238_v57  ;;  %v1240_v59 = vmul.f32 1.442695, %v1237_v58  ;;  %v1932_v57 = vld [vmem:[%s2972_s9 + $0xf] ss:$0 sm:$0xff] }
 0xfb1   :  { %2283 = vpow2.f32 %v1240_v59 }
 0xfb9   :  { %v2282_v60 = vpop.eup %2281 }
 0xfba   :  { %v1242_v0 = vsel %vm356_vm9, %v2282_v60, 0.0 }
 0xfbb   :  { %v2284_v1 = vpop.eup %2283  ;;  %1243 = vadd.xlane.f32.xlu1 %v1242_v0 }
 0xfbc   :  { %v1245_v61 = vsel %vm356_vm9, %v2284_v1, 0.0 }
 0xfbf   :  { %1246 = vadd.xlane.f32.xlu1 %v1245_v61  ;;  %v2230_v61 = vld [vmem:[%s2971_s8 + $0x48] sm:$0xff]  }
 0xfd0   :  { %1253 = vrot.lane.b32.xlu1 %v2787_v7, %s2350_s2  ;;  %v2225_v7 = vld [vmem:[%s2969_s6 + $0x10] sm:$0xff]  }
0x1048   :  { %v1244_v12 = vpop.xlane.xlu1 %1243 }
0x1049   :  { %2285 = vrcp.f32 %v1244_v12  ;;  %v2232_v12 = vld [vmem:[%s2971_s8 + $0x58] sm:$0xff]  }
0x104c   :  { %v1247_v3 = vpop.xlane.xlu1 %1246 }
0x104d   :  { %2287 = vrcp.f32 %v1247_v3  ;;  %v2233_v3 = vld [vmem:[%s2971_s8 + $0x60] sm:$0xff]  }
0x1050   :  { %v1254_v4 = vpop.permute.xlu1 %1253 }
0x1051   :  { %2139 = vmatpush3.bf16.msra.mxu0 %v1254_v4  ;;  %v2234_v4 = vld [vmem:[%s2971_s8 + $0x68] sm:$0xff]  }
0x1052   :  { %2150 = vmatprep.subr.bf16.mxu0 %v2344_v21 }
0x1053   :  { %v2286_v5 = vpop.eup %2285 }
0x1054   :  { %v1250_v8 = vmul.f32 %v2286_v5, %v2282_v60  ;;  %v2235_v5 = vld [vmem:[%s2971_s8 + $0x70] sm:$0xff]  }
0x1057   :  { %v2288_v6 = vpop.eup %2287 }
0x1058   :  { %v1251_v9 = vmul.f32 %v2288_v6, %v2284_v1  ;;  %v2229_v1 = vld [vmem:[%s2971_s8 + $0x40] sm:$0xff]   ;;  %v2236_v6 = vld [vmem:[%s2971_s8 + $0x78] sm:$0xff]  }
0x105a   :  { %v1252_v10 = vpack.c.bf16 %v1251_v9, %v1250_v8  ;;  %v1937_v8 = vld [vmem:[%s2972_s9 + $0x10] ss:$0 sm:$0xff] }
0x105c   :  { %2141 = vmatmul.mubr.msk.bf16.vlgmr.msra.gmra.mrb[16].mxu0 %vm356_vm9, %v1252_v10 }
0x105d   :  { %2151 = vmatpush3.bf16.msra.mxu0 %v2225_v7  ;;  %2152 = vmatprep.mubr.msk.bf16.mxu0 %vm2345_vm8, %v2344_v21 }
0x105e   :  { %2164 = vmatprep.subr.bf16.mxu0 %v2344_v21 }
0x1064   :  { %2153 = vmatmul.mubr.msk.bf16.vlgmr.msra.gmra.mrb[20].mxu0 %vm356_vm9, %v1178_v44  ;;  %v2228_v44 = vld [vmem:[%s2970_s7 + $0x18] sm:$0xff]  }
0x1065   :  { %2180 = vmatprep.mubr.msk.bf16.mxu0 %vm2345_vm8, %v2344_v21  ;;  %2165 = vmatpush3.bf16.msra.mxu0 %v2229_v1 }
0x1066   :  { %2166 = vmatprep.subr.bf16.mxu0 %v2344_v21 }
0x1069   :  { %2167 = vmatpush3.bf16.msra.mxu0 %v2230_v61 }
0x106a   :  { %2168 = vmatprep.subr.bf16.mxu0 %v2344_v21 }
0x106d   :  { %2169 = vmatpush3.bf16.msra.mxu0 %v2231_v2  ;;  %v1966_v2 = vld [vmem:[%s2972_s9 + $0x12] ss:$0 sm:$0xff] }
0x106e   :  { %2170 = vmatprep.subr.bf16.mxu0 %v2344_v21 }
0x1071   :  { %2171 = vmatpush3.bf16.msra.mxu0 %v2232_v12 }
0x1072   :  { %2172 = vmatprep.subr.bf16.mxu0 %v2344_v21 }
0x1075   :  { %2173 = vmatpush3.bf16.msra.mxu0 %v2233_v3 }
0x1076   :  { %2174 = vmatprep.subr.bf16.mxu0 %v2344_v21 }
0x1079   :  { %2175 = vmatpush3.bf16.msra.mxu0 %v2234_v4 }
0x107a   :  { %2176 = vmatprep.subr.bf16.mxu0 %v2344_v21 }
0x107d   :  { %2177 = vmatpush3.bf16.msra.mxu0 %v2235_v5  ;;  %v1967_v5 = vld [vmem:[%s2972_s9 + $0x13] ss:$0 sm:$0xff] }
0x107e   :  { %2178 = vmatprep.subr.bf16.mxu0 %v2344_v21 }
0x1081   :  { %2179 = vmatpush3.bf16.msra.mxu0 %v2236_v6 }
0x112f   :  { %v1293_v11 = vpop.f32.mrb[16].mxu0 }
0x1130   :  { %v2142_v13 = vpop.f32.mrb[17].mxu0 }
0x1131   :  { %v1296_v14 = vpop.f32.mrb[18].mxu0 }
0x1132   :  { %v1302_v15 = vpack.c.bf16 %v1296_v14, %v1293_v11  ;;  %v2143_v16 = vpop.f32.mrb[19].mxu0 }
0x1134   :  { %2147 = vmatmul.mubr.msk.bf16.vlgmr.msra.gmra.mrb[36].mxu1 %vm356_vm9, %v1302_v15 }
0x1135   :  { %2160 = vmatprep.mubr.msk.bf16.mxu1 %vm2345_vm8, %v2344_v21 }
0x1137   :  { %v1396_v17 = vpop.f32.mrb[20].mxu0 }
0x1138   :  { %v2154_v18 = vpop.f32.mrb[21].mxu0 }
0x1139   :  { %v1399_v19 = vpop.f32.mrb[22].mxu0 }
0x113a   :  { %v2155_v20 = vpop.f32.mrb[23].mxu0 }
0x1207   :  { %v1346_v22 = vpop.f32.mrb[36].mxu1 }
0x1208   :  { %v1397_v24 = vadd.f32 %v1396_v17, %v1346_v22  ;;  %v2148_v25 = vpop.f32.mrb[37].mxu1 }
0x1209   :  { %v1349_v26 = vpop.f32.mrb[38].mxu1 }
0x120a   :  { %v1408_v27 = vadd.f32 %v1930_v23, %v1397_v24  ;;  %v1400_v28 = vadd.f32 %v1399_v19, %v1349_v26  ;;  %v2149_v29 = vpop.f32.mrb[39].mxu1 }
0x120c   :  { %v1409_v37 = vadd.f32 %v1930_v23, %v1400_v28  ;;  %v1410_v38 = vadd.f32 %v1408_v27, %v2775_v62 }
0x120e   :  { %v1414_v30 = vsel %vm232_vm7, %v1410_v38, 0.0  ;;  %v1411_v31 = vadd.f32 %v1409_v37, %v2777_v63  ;;  %v2227_v63 = vld [vmem:[%s2970_s7 + $0x10] sm:$0xff]  }
0x120f   :  { %1415 = vadd.xlane.f32.xlu0 %v1414_v30  ;;  %2157 = vmatpush3.bf16.msra.mxu1 %v2227_v63 }
0x1210   :  { %v1417_v32 = vsel %vm232_vm7, %v1411_v31, 0.0  ;;  %2158 = vmatprep.subr.bf16.mxu1 %v2344_v21 }
0x1213   :  { %1418 = vadd.xlane.f32.xlu0 %v1417_v32  ;;  %2159 = vmatpush3.bf16.msra.mxu1 %v2228_v44 }
0x1214   :  { %2184 = vmatprep.subr.bf16.mxu1 %v2344_v21 }
0x129c   :  { %v1416_v33 = vpop.xlane.xlu0 %1415 }
0x129d   :  { %v1420_v34 = vmul.f32 0.03125, %v1416_v33  ;;  %v1957_v33 = vld [vmem:[%s2972_s9 + $0x11] ss:$0 sm:$0xff] }
0x129f   :  { %v1422_v35 = vsub.f32 %v1410_v38, %v1420_v34 }
0x12a0   :  { %v1419_v36 = vpop.xlane.xlu0 %1418 }
0x12a1   :  { %v1421_v39 = vmul.f32 0.03125, %v1419_v36  ;;  %v1424_v40 = vmul.f32 %v1422_v35, %v1422_v35 }
0x12a3   :  { %v1423_v41 = vsub.f32 %v1411_v31, %v1421_v39  ;;  %v1426_v42 = vsel %vm232_vm7, %v1424_v40, 0.0 }
0x12a4   :  { %1427 = vadd.xlane.f32.xlu0 %v1426_v42 }
0x12a5   :  { %v1425_v43 = vmul.f32 %v1423_v41, %v1423_v41 }
0x12a7   :  { %v1429_v62 = vsel %vm232_vm7, %v1425_v43, 0.0 }
0x12a8   :  { %1430 = vadd.xlane.f32.xlu0 %v1429_v62 }
0x1331   :  { %v1428_v45 = vpop.xlane.xlu0 %1427 }
0x1332   :  { %v1432_v46 = vmul.f32 0.03125, %v1428_v45 }
0x1334   :  { %v1434_v48 = vadd.f32 1e-12, %v1432_v46 }
0x1335   :  { %v1431_v47 = vpop.xlane.xlu0 %1430 }
0x1336   :  { %2289 = vrsqrt.f32 %v1434_v48  ;;  %v1433_v49 = vmul.f32 0.03125, %v1431_v47 }
0x1338   :  { %v1435_v50 = vadd.f32 1e-12, %v1433_v49 }
0x133a   :  { %2291 = vrsqrt.f32 %v1435_v50 }
0x1340   :  { %v2290_v51 = vpop.eup %2289 }
0x1341   :  { %v1438_v52 = vmul.f32 %v2290_v51, %v1422_v35 }
0x1343   :  { %v1444_v55 = vmul.f32 %v1931_v53, %v1438_v52 }
0x1344   :  { %v2292_v54 = vpop.eup %2291 }
0x1345   :  { %v1439_v56 = vmul.f32 %v2292_v54, %v1423_v41  ;;  %v2867_v59 = vadd.f32 %v1932_v57, %v1444_v55  ;;  %v2237_v54 = vld [vmem:[%s2973_s10] sm:$0xff]   ;;  %v2238_v55 = vld [vmem:[%s2973_s10 + $0x8] sm:$0xff]  }
0x1347   :  { %v1445_v58 = vmul.f32 %v1931_v53, %v1439_v56 }
0x1349   :  { %v2869_v60 = vadd.f32 %v1932_v57, %v1445_v58 }
0x134b   :  { %v1457_v0 = vpack.c.bf16 %v2869_v60, %v2867_v59 }
0x134d   :  { %2161 = vmatmul.mubr.msk.bf16.vlgmr.msra.gmra.mrb[40].mxu1 %vm232_vm7, %v1457_v0 }
0x134e   :  { %2188 = vmatprep.mubr.msk.bf16.mxu1 %vm2345_vm8, %v2344_v21  ;;  %2185 = vmatpush3.bf16.msra.mxu1 %v2237_v54 }
0x134f   :  { %2186 = vmatprep.subr.bf16.mxu1 %v2344_v21 }
0x1352   :  { %2187 = vmatpush3.bf16.msra.mxu1 %v2238_v55 }
0x1353   :  { %2192 = vmatprep.subr.bf16.mxu1 %v2344_v21 }
0x1420   :  { %v1512_v9 = vpop.f32.mrb[40].mxu1 }
0x1421   :  { %v1513_v7 = vadd.f32 %v1937_v8, %v1512_v9  ;;  %v2162_v10 = vpop.f32.mrb[41].mxu1 }
0x1422   :  { %v1515_v11 = vpop.f32.mrb[42].mxu1  ;;  %v2239_v10 = vld [vmem:[%s2973_s10 + $0x10] sm:$0xff]  }
0x1423   :  { %v1519_v13 = vmul.f32 %v1513_v7, %v1513_v7  ;;  %v1516_v14 = vadd.f32 %v1937_v8, %v1515_v11  ;;  %v2163_v15 = vpop.f32.mrb[43].mxu1  ;;  %v2240_v11 = vld [vmem:[%s2973_s10 + $0x18] sm:$0xff]  }
0x1425   :  { %v1521_v16 = vmul.f32 %v1519_v13, %v1513_v7  ;;  %v1520_v17 = vmul.f32 %v1516_v14, %v1516_v14  ;;  %v1968_v13 = vld [vmem:[%s2972_s9 + $0x2] ss:$0 sm:$0xff] }
0x1427   :  { %v1523_v18 = vmul.f32 0.044715, %v1521_v16  ;;  %v1522_v19 = vmul.f32 %v1520_v17, %v1516_v14 }
0x1429   :  { %v1525_v20 = vadd.f32 %v1523_v18, %v1513_v7  ;;  %v1524_v22 = vmul.f32 0.044715, %v1522_v19 }
0x142b   :  { %v1527_v23 = vmul.f32 0.7978846, %v1525_v20  ;;  %v1526_v24 = vadd.f32 %v1524_v22, %v1516_v14 }
0x142d   :  { %2293 = vtanh.f32 %v1527_v23  ;;  %v1528_v25 = vmul.f32 0.7978846, %v1526_v24 }
0x142f   :  { %2295 = vtanh.f32 %v1528_v25  ;;  %v1976_v25 = vld [vmem:[%s2972_s9 + $0x3] ss:$0 sm:$0xff] }
0x1437   :  { %v2294_v26 = vpop.eup %2293 }
0x1438   :  { %v1531_v27 = vadd.f32 1.0, %v2294_v26 }
0x1439   :  { %v2296_v28 = vpop.eup %2295 }
0x143a   :  { %v1533_v29 = vmul.f32 0.5, %v1531_v27  ;;  %v1532_v37 = vadd.f32 1.0, %v2296_v28 }
0x143c   :  { %v1534_v38 = vmul.f32 0.5, %v1532_v37  ;;  %v1535_v30 = vmul.f32 %v1533_v29, %v1513_v7 }
0x143e   :  { %v1536_v31 = vmul.f32 %v1534_v38, %v1516_v14 }
0x1440   :  { %v1554_v32 = vpack.c.bf16 %v1536_v31, %v1535_v30 }
0x1442   :  { %2181 = vmatmul.mubr.bf16.vlgmr.msra.gmra.mrb[24].mxu0 %v1554_v32 }
0x1515   :  { %v1642_v34 = vpop.f32.mrb[24].mxu0 }
0x1516   :  { %v1643_v35 = vadd.f32 %v1957_v33, %v1642_v34  ;;  %v2182_v36 = vpop.f32.mrb[25].mxu0 }
0x1517   :  { %v1645_v39 = vpop.f32.mrb[26].mxu0 }
0x1518   :  { %v1646_v40 = vadd.f32 %v1957_v33, %v1645_v39  ;;  %v2183_v41 = vpop.f32.mrb[27].mxu0  ;;  %v1649_v42 = vadd.f32 %v1643_v35, %v2867_v59 }
0x151a   :  { %v1653_v43 = vsel %vm232_vm7, %v1649_v42, 0.0  ;;  %v1650_v62 = vadd.f32 %v1646_v40, %v2869_v60 }
0x151b   :  { %1654 = vadd.xlane.f32.xlu1 %v1653_v43 }
0x151c   :  { %v1656_v63 = vsel %vm232_vm7, %v1650_v62, 0.0 }
0x151d   :  { %1657 = vadd.xlane.f32.xlu0 %v1656_v63 }
0x15a8   :  { %v1655_v44 = vpop.xlane.xlu1 %1654 }
0x15a9   :  { %v1659_v45 = vmul.f32 0.03125, %v1655_v44 }
0x15aa   :  { %v1658_v46 = vpop.xlane.xlu0 %1657 }
0x15ab   :  { %v1661_v48 = vsub.f32 %v1649_v42, %v1659_v45  ;;  %v1660_v47 = vmul.f32 0.03125, %v1658_v46 }
0x15ad   :  { %v1662_v49 = vsub.f32 %v1650_v62, %v1660_v47  ;;  %v1663_v50 = vmul.f32 %v1661_v48, %v1661_v48 }
0x15af   :  { %v1665_v51 = vsel %vm232_vm7, %v1663_v50, 0.0  ;;  %v1664_v52 = vmul.f32 %v1662_v49, %v1662_v49 }
0x15b0   :  { %1666 = vadd.xlane.f32.xlu0 %v1665_v51 }
0x15b1   :  { %v1668_v53 = vsel %vm232_vm7, %v1664_v52, 0.0 }
0x15b4   :  { %1669 = vadd.xlane.f32.xlu0 %v1668_v53 }
0x163d   :  { %v1667_v56 = vpop.xlane.xlu0 %1666 }
0x163e   :  { %v1671_v57 = vmul.f32 0.03125, %v1667_v56 }
0x1640   :  { %v1673_v58 = vadd.f32 1e-12, %v1671_v57 }
0x1641   :  { %v1670_v59 = vpop.xlane.xlu0 %1669 }
0x1642   :  { %2297 = vrsqrt.f32 %v1673_v58  ;;  %v1672_v60 = vmul.f32 0.03125, %v1670_v59 }
0x1644   :  { %v1674_v0 = vadd.f32 1e-12, %v1672_v60 }
0x1646   :  { %2299 = vrsqrt.f32 %v1674_v0 }
0x164c   :  { %v2298_v1 = vpop.eup %2297 }
0x164d   :  { %v1677_v61 = vmul.f32 %v2298_v1, %v1661_v48 }
0x164f   :  { %v1683_v3 = vmul.f32 %v1966_v2, %v1677_v61 }
0x1650   :  { %v2300_v12 = vpop.eup %2299 }
0x1651   :  { %v1678_v4 = vmul.f32 %v2300_v12, %v1662_v49  ;;  %v1689_v8 = vadd.f32 %v1967_v5, %v1683_v3 }
0x1653   :  { %v1684_v6 = vmul.f32 %v1966_v2, %v1678_v4 }
0x1655   :  { %v1690_v9 = vadd.f32 %v1967_v5, %v1684_v6 }
0x1657   :  { %v1695_v7 = vpack.c.bf16 %v1690_v9, %v1689_v8 }
0x1659   :  { %2189 = vmatmul.mubr.msk.bf16.vlgmr.msra.gmra.mrb[44].mxu1 %vm232_vm7, %v1695_v7 }
0x165a   :  { %2196 = vmatprep.mubr.msk.bf16.mxu1 %vm2345_vm8, %v2344_v21  ;;  %2193 = vmatpush3.bf16.msra.mxu1 %v2239_v10 }
0x165b   :  { %2194 = vmatprep.subr.bf16.mxu1 %v2344_v21 }
0x165e   :  { %2195 = vmatpush3.bf16.msra.mxu1 %v2240_v11 }
0x172c   :  { %v1750_v14 = vpop.f32.mrb[44].mxu1 }
0x172d   :  { %v1751_v15 = vadd.f32 %v1968_v13, %v1750_v14  ;;  %v2190_v16 = vpop.f32.mrb[45].mxu1 }
0x172e   :  { %v1753_v17 = vpop.f32.mrb[46].mxu1 }
0x172f   :  { %v1754_v18 = vadd.f32 %v1968_v13, %v1753_v17  ;;  %v2191_v19 = vpop.f32.mrb[47].mxu1  ;;  %2301 = vtanh.f32 %v1751_v15 }
0x1731   :  { %2303 = vtanh.f32 %v1754_v18 }
0x1739   :  { %v2302_v20 = vpop.eup %2301 }
0x173b   :  { %v2304_v22 = vpop.eup %2303 }
0x173c   :  { %v1764_v23 = vpack.c.bf16 %v2304_v22, %v2302_v20 }
0x173e   :  { %2197 = vmatmul.mubr.msk.bf16.vlgmr.msra.gmra.mrb[48].mxu1 %vm232_vm7, %v1764_v23 }
0x1811   :  { %v1819_v24 = vpop.f32.mrb[48].mxu1 }
0x1812   :  { %v2198_v21 = vpop.f32.mrb[49].mxu1  ;;  %v1820_v29 = vadd.f32 %v1976_v25, %v1819_v24 }
0x1813   :  { %v1822_v26 = vpop.f32.mrb[50].mxu1 }
0x1814   :  { %v1823_v27 = vadd.f32 %v1976_v25, %v1822_v26  ;;  %v2199_v28 = vpop.f32.mrb[51].mxu1 }
0x1816   :  { %v1827_v37 = vrot.slane %v1823_v27, 7 }
0x1818   :  { %v1829_v38 = vsel %vm209_vm0, %v1820_v29, %v1827_v37 }
0x1819   :  { %1831 = vst.msk [vmem:[#allocation5] sm:$0x3] %vm1830_vm10, %v1829_v38 }
0x181a   :  { %2328 = shalt.err (!%p2325_p9)
}
0x181b   :  { %s2329_s3 = scalar_lea.hbm %s2974_s11, 32 }
0x181c   :  { %p2330_p10 = scmp.ne.s32.totalorder %s2974_s11, %s2329_s3  ;;  %p2333_p11 = scmp.lt.u32.totalorder %s2329_s3, %s2974_s11 }
0x181e   :  { %p2335_p12 = pnand %p2333_p11, %p2330_p10 }
0x1820   :  { %2338 = shalt.err (!%p2335_p12)
}
0x1821   :  { %1841 = dma.vmem_to_hbm [thread:$0]  %s1839_s12, 32, %s2974_s11, [#allocation3]  }
0x1822   :  { %2341 = dma.done.wait [#allocation3], 32  }
0x1823   :  { %2342 = vsyncadd [#allocation3], 4294967264 }
0x1824   :  { %1845 = vsyncpa [#allocation3], 1 }
0x1825   :  { %1846 = vsyncpa [#allocation4], 1 }

</bundles_post_ra>
